<compile_context>
chip_gen: v7x
topology: tpu7x:2x2x1
jax: 0.10.0
libtpu: 0.0.40
codegen_flags: <defaults>
</compile_context>

<pallas_src>
import functools
import math

import jax
import jax.numpy as jnp
from jax.experimental import pallas as pl
from jax.experimental.pallas import tpu as pltpu


# ----------------------------------------------------------------------------
# Synthetic BERT config
# ----------------------------------------------------------------------------
VOCAB = 128
HIDDEN = 32
N_HEADS = 2
HEAD_DIM = HIDDEN // N_HEADS
N_LAYERS = 2
INTERMEDIATE = 64
MAX_POS = 16
TYPE_VOCAB = 2
N_CLASSES = 5
LN_EPS = 1e-12
LANE = 128          # lane-dense padding for the logits output


# ----------------------------------------------------------------------------
# Fused encoder + pooler + classifier kernel (one grid step = whole batch)
# ----------------------------------------------------------------------------
def _encoder_classifier_kernel(
    x_ref,        # (B*S, H)    f32 embeddings (pre emb-LN), batch folded into rows
    addm_ref,     # (B*S, B*S)  f32 additive mask (block-diag per batch + key padding)
    embln_ref,    # (2, H)      f32 [gamma; beta] of embedding LayerNorm
    wqkv_ref,     # (L, H, 3H)  bf16 (1/sqrt(Dh) folded into the Q block)
    bqkv_ref,     # (L, 1, 3H)  f32
    wo_ref,       # (L, H, H)   bf16
    wi_ref,       # (L, H, I)   bf16
    bi_ref,       # (L, 1, I)   f32
    wf_ref,       # (L, I, H)   bf16
    vech_ref,     # (L, 6, H)   f32 [bo; ln1_g; ln1_b; bf; ln2_g; ln2_b]
    pool_w_ref,   # (H, H)      bf16
    pool_b_ref,   # (1, H)      f32
    cls_w_ref,    # (H, LANE)   bf16 (zero-padded beyond N_CLASSES)
    cls_b_ref,    # (1, LANE)   f32  (zero-padded)
    o_ref,        # (B, LANE)   f32 lane-padded logits
    *, n_layers, n_heads, head_dim, batch, seq, eps):

    H = n_heads * head_dim
    bf16 = jnp.bfloat16

    def ln(v, g, b):
        mu = jnp.mean(v, axis=-1, keepdims=True)
        var = jnp.mean((v - mu) * (v - mu), axis=-1, keepdims=True)
        return (v - mu) * jax.lax.rsqrt(var + eps) * g + b

    # Static per-head lane masks: lets each head's matmuls read/write only its
    # own lanes (no per-head lane slicing, no lane concat of head outputs).
    lane_idx = jax.lax.broadcasted_iota(jnp.int32, (1, H), 1)
    head_masks = [
        ((lane_idx >= h * head_dim) & (lane_idx < (h + 1) * head_dim)
         ).astype(jnp.float32)
        for h in range(n_heads)
    ]

    add_mask = addm_ref[...]                                        # (BS, BS)

    # Embedding LayerNorm (dropout = eval-mode identity).
    x = ln(x_ref[...], embln_ref[0:1, :], embln_ref[1:2, :])        # (BS, H) f32

    for l in range(n_layers):                       # static unroll (L=2)
        vh = vech_ref[l]                            # (6, H)
        bo_v, ln1_g, ln1_b = vh[0:1, :], vh[1:2, :], vh[2:3, :]
        bf_v, ln2_g, ln2_b = vh[3:4, :], vh[4:5, :], vh[5:6, :]

        # --- fused Q|K|V projection: one (BS, 3H) MXU push ---
        qkv = jnp.dot(x.astype(bf16), wqkv_ref[l],
                      preferred_element_type=jnp.float32) + bqkv_ref[l]
        q = qkv[:, 0:H]          # already scaled by 1/sqrt(Dh) via weight fold
        k = qkv[:, H:2 * H]
        v = qkv[:, 2 * H:3 * H]

        # --- per-head attention over the whole folded batch; the block-diag
        #     additive mask keeps batch elements (and padding) separated ---
        ctx = jnp.zeros_like(x)                                     # (BS, H) f32
        for h in range(n_heads):                    # static unroll (Hn=2)
            mh = head_masks[h]                                      # (1, H)
            s = jnp.einsum("qd,kd->qk",
                           (q * mh).astype(bf16), k.astype(bf16),
                           preferred_element_type=jnp.float32)      # (BS, BS)
            s = s + add_mask
            s = s - jnp.max(s, axis=-1, keepdims=True)
            p = jnp.exp(s)
            p = p * pl.reciprocal(jnp.sum(p, axis=-1, keepdims=True),
                                  approx=True)
            # Head-h context lands only in head-h lanes; summing heads
            # reproduces the concatenated multi-head output.
            ctx = ctx + jnp.dot(p.astype(bf16), (v * mh).astype(bf16),
                                preferred_element_type=jnp.float32)

        # --- output projection + fused residual + LayerNorm ---
        attn_out = jnp.dot(ctx.astype(bf16), wo_ref[l],
                           preferred_element_type=jnp.float32) + bo_v
        x = ln(attn_out + x, ln1_g, ln1_b)

        # --- feed-forward (GELU) + fused residual + LayerNorm ---
        inter = jnp.dot(x.astype(bf16), wi_ref[l],
                        preferred_element_type=jnp.float32) + bi_ref[l]
        # tanh-approximate GELU ("gelu_new"); exact-erf GELU differs at ~1e-3.
        inter = 0.5 * inter * (1.0 + jnp.tanh(
            0.7978845608028654 * (inter + 0.044715 * inter * inter * inter)))
        ff = jnp.dot(inter.astype(bf16), wf_ref[l],
                     preferred_element_type=jnp.float32) + bf_v
        x = ln(ff + x, ln2_g, ln2_b)

    # --- fused BERT pooler + classifier head (CLS token of every batch row) ---
    cls_tok = jnp.concatenate(
        [x[b * seq:b * seq + 1, :] for b in range(batch)], axis=0)   # (B, H)
    pooled = jnp.tanh(jnp.dot(cls_tok.astype(bf16), pool_w_ref[...],
                              preferred_element_type=jnp.float32)
                      + pool_b_ref[...])
    # self.drop(pooled): eval-mode identity.
    # TODO(synk): training-mode dropout (pltpu.prng_*) not implemented.
    logits = jnp.dot(pooled.astype(bf16), cls_w_ref[...],
                     preferred_element_type=jnp.float32) + cls_b_ref[...]
    o_ref[...] = logits                                              # (B, LANE)


# ----------------------------------------------------------------------------
# Deterministic parameter init
# ----------------------------------------------------------------------------
def init_params(key):
    def nrm(k, shape, scale=0.02):
        return (scale * jax.random.normal(k, shape)).astype(jnp.float32)

    keys = iter(jax.random.split(key, 64))
    p = {
        "word_emb": nrm(next(keys), (VOCAB, HIDDEN)),
        "pos_emb": nrm(next(keys), (MAX_POS, HIDDEN)),
        "type_emb": nrm(next(keys), (TYPE_VOCAB, HIDDEN)),
        "emb_ln_g": jnp.ones((HIDDEN,), jnp.float32),
        "emb_ln_b": jnp.zeros((HIDDEN,), jnp.float32),
        "layers": [],
        "pooler_w": nrm(next(keys), (HIDDEN, HIDDEN)),
        "pooler_b": jnp.zeros((HIDDEN,), jnp.float32),
        "cls_w": nrm(next(keys), (HIDDEN, N_CLASSES)),
        "cls_b": jnp.zeros((N_CLASSES,), jnp.float32),
    }
    for _ in range(N_LAYERS):
        p["layers"].append({
            "wq": nrm(next(keys), (HIDDEN, HIDDEN)), "bq": jnp.zeros((HIDDEN,), jnp.float32),
            "wk": nrm(next(keys), (HIDDEN, HIDDEN)), "bk": jnp.zeros((HIDDEN,), jnp.float32),
            "wv": nrm(next(keys), (HIDDEN, HIDDEN)), "bv": jnp.zeros((HIDDEN,), jnp.float32),
            "wo": nrm(next(keys), (HIDDEN, HIDDEN)), "bo": jnp.zeros((HIDDEN,), jnp.float32),
            "ln1_g": jnp.ones((HIDDEN,), jnp.float32), "ln1_b": jnp.zeros((HIDDEN,), jnp.float32),
            "wi": nrm(next(keys), (HIDDEN, INTERMEDIATE)), "bi": jnp.zeros((INTERMEDIATE,), jnp.float32),
            "wf": nrm(next(keys), (INTERMEDIATE, HIDDEN)), "bf": jnp.zeros((HIDDEN,), jnp.float32),
            "ln2_g": jnp.ones((HIDDEN,), jnp.float32), "ln2_b": jnp.zeros((HIDDEN,), jnp.float32),
        })
    return p


def _pack_params(params):
    """Stack/pack weights: bf16 MXU operands, scale folded into Q, few inputs."""
    H, I, C = HIDDEN, INTERMEDIATE, N_CLASSES
    scale = 1.0 / math.sqrt(HEAD_DIM)
    layers = params["layers"]

    wqkv = jnp.stack([jnp.concatenate([lp["wq"] * scale, lp["wk"], lp["wv"]],
                                      axis=1) for lp in layers]
                     ).astype(jnp.bfloat16)                       # (L, H, 3H)
    bqkv = jnp.stack([jnp.concatenate([lp["bq"] * scale, lp["bk"], lp["bv"]]
                                      ).reshape(1, 3 * H) for lp in layers]
                     ).astype(jnp.float32)                        # (L, 1, 3H)
    wo = jnp.stack([lp["wo"] for lp in layers]).astype(jnp.bfloat16)
    wi = jnp.stack([lp["wi"] for lp in layers]).astype(jnp.bfloat16)
    bi = jnp.stack([lp["bi"].reshape(1, I) for lp in layers]).astype(jnp.float32)
    wf = jnp.stack([lp["wf"] for lp in layers]).astype(jnp.bfloat16)
    # All H-wide per-layer vectors packed into one (L, 6, H) array.
    vech = jnp.stack([jnp.stack([lp["bo"], lp["ln1_g"], lp["ln1_b"],
                                 lp["bf"], lp["ln2_g"], lp["ln2_b"]])
                      for lp in layers]).astype(jnp.float32)      # (L, 6, H)

    embln = jnp.stack([params["emb_ln_g"], params["emb_ln_b"]]
                      ).astype(jnp.float32)                       # (2, H)
    pool_w = params["pooler_w"].astype(jnp.bfloat16)              # (H, H)
    pool_b = params["pooler_b"].reshape(1, H).astype(jnp.float32)
    # Lane-dense classifier head (pad 5 classes -> 128 lanes).
    cls_w = jnp.zeros((H, LANE), jnp.float32).at[:, :C].set(params["cls_w"]
                                                            ).astype(jnp.bfloat16)
    cls_b = jnp.zeros((1, LANE), jnp.float32).at[0, :C].set(params["cls_b"])
    return (embln, wqkv, bqkv, wo, wi, bi, wf, vech, pool_w, pool_b, cls_w, cls_b)


# ----------------------------------------------------------------------------
# Forward pass: embeddings (gather glue) -> one fused Pallas kernel -> logits
# ----------------------------------------------------------------------------
def intent_classifier_forward(params, input_ids, attention_mask,
                              field_indices=None, field_token_masks=None):
    # field_indices / field_token_masks accepted but unused (as in the reference).
    B, S = input_ids.shape
    H, L, I, C = HIDDEN, N_LAYERS, INTERMEDIATE, N_CLASSES

    # --- embeddings (token/pos/type gather stays in JAX glue) ---
    token_type_ids = jnp.zeros_like(input_ids)
    x = (params["word_emb"][input_ids]
         + params["pos_emb"][jnp.arange(S)][None, :, :]
         + params["type_emb"][token_type_ids])                     # (B, S, H)
    x2d = x.reshape(B * S, H).astype(jnp.float32)

    # Additive mask on the folded (B*S, B*S) score tile: block-diagonal per
    # batch element plus key-side padding (BERT's (1 - mask) * -1e4).
    key_keep = attention_mask.astype(jnp.float32).reshape(B * S)   # (B*S,)
    seg = jnp.arange(B * S) // S
    same_batch = (seg[:, None] == seg[None, :]).astype(jnp.float32)
    add_mask = (1.0 - same_batch * key_keep[None, :]) * -10000.0   # (B*S, B*S)

    (embln, wqkv, bqkv, wo, wi, bi, wf, vech,
     pool_w, pool_b, cls_w, cls_b) = _pack_params(params)

    kernel = functools.partial(
        _encoder_classifier_kernel,
        n_layers=L, n_heads=N_HEADS, head_dim=HEAD_DIM,
        batch=B, seq=S, eps=LN_EPS)

    full2 = lambda i: (0, 0)
    full3 = lambda i: (0, 0, 0)

    logits_pad = pl.pallas_call(
        kernel,
        out_shape=jax.ShapeDtypeStruct((B, LANE), jnp.float32),
        grid=(1,),                                   # whole batch in one step
        in_specs=[
            pl.BlockSpec((B * S, H), full2),         # x (batch folded into rows)
            pl.BlockSpec((B * S, B * S), full2),     # additive attention mask
            pl.BlockSpec((2, H), full2),             # embedding LN gamma/beta
            pl.BlockSpec((L, H, 3 * H), full3),      # wqkv (bf16, scale folded)
            pl.BlockSpec((L, 1, 3 * H), full3),      # bqkv
            pl.BlockSpec((L, H, H), full3),          # wo
            pl.BlockSpec((L, H, I), full3),          # wi
            pl.BlockSpec((L, 1, I), full3),          # bi
            pl.BlockSpec((L, I, H), full3),          # wf
            pl.BlockSpec((L, 6, H), full3),          # packed per-layer vectors
            pl.BlockSpec((H, H), full2),             # pooler_w
            pl.BlockSpec((1, H), full2),             # pooler_b
            pl.BlockSpec((H, LANE), full2),          # cls_w (lane padded)
            pl.BlockSpec((1, LANE), full2),          # cls_b (lane padded)
        ],
        out_specs=pl.BlockSpec((B, LANE), full2),    # lane-dense logits slab
        compiler_params=pltpu.CompilerParams(
            dimension_semantics=("arbitrary",)),
    )(x2d, add_mask, embln, wqkv, bqkv, wo, wi, bi, wf, vech,
      pool_w, pool_b, cls_w, cls_b)

    return logits_pad[:, :C]


if __name__ == "__main__":
    key = jax.random.PRNGKey(0)
    pkey, ikey = jax.random.split(key)
    params = init_params(pkey)

    B, S = 2, 8
    input_ids = jax.random.randint(ikey, (B, S), 0, VOCAB, dtype=jnp.int32)
    attention_mask = jnp.array([[1, 1, 1, 1, 1, 1, 0, 0],
                                [1, 1, 1, 1, 0, 0, 0, 0]], dtype=jnp.int32)
    field_indices = jnp.zeros((B, S), jnp.int32)        # unused by forward
    field_token_masks = jnp.ones((B, S), jnp.int32)     # unused by forward

    logits = intent_classifier_forward(params, input_ids, attention_mask,
                                       field_indices, field_token_masks)
    jax.block_until_ready(logits)
    assert logits.shape == (B, N_CLASSES) and logits.dtype == jnp.float32
    assert bool(jnp.all(jnp.isfinite(logits)))
    print("KERNEL_OK")
</pallas_src>

<mosaic_0001>
module attributes {stable_mosaic.version = 11 : i64} {
  func.func @_encoder_classifier_kernel(%arg0: i32, %arg1: memref<16x32xf32, #tpu.memory_space<vmem>>, %arg2: memref<16x16xf32, #tpu.memory_space<vmem>>, %arg3: memref<2x32xf32, #tpu.memory_space<vmem>>, %arg4: memref<2x32x96xbf16, #tpu.memory_space<vmem>>, %arg5: memref<2x1x96xf32, #tpu.memory_space<vmem>>, %arg6: memref<2x32x32xbf16, #tpu.memory_space<vmem>>, %arg7: memref<2x32x64xbf16, #tpu.memory_space<vmem>>, %arg8: memref<2x1x64xf32, #tpu.memory_space<vmem>>, %arg9: memref<2x64x32xbf16, #tpu.memory_space<vmem>>, %arg10: memref<2x6x32xf32, #tpu.memory_space<vmem>>, %arg11: memref<32x32xbf16, #tpu.memory_space<vmem>>, %arg12: memref<1x32xf32, #tpu.memory_space<vmem>>, %arg13: memref<32x128xbf16, #tpu.memory_space<vmem>>, %arg14: memref<1x128xf32, #tpu.memory_space<vmem>>, %arg15: memref<2x128xf32, #tpu.memory_space<vmem>>) attributes {dimension_semantics = [#tpu.dimension_semantics<arbitrary>], iteration_bounds = array<i64: 1>, scalar_prefetch = 0 : i64, scratch_operands = 0 : i64, tpu.core_type = #tpu.core_type<tc>, window_params = [{pipeline_mode = #tpu.pipeline_mode<synchronous>, transform_indices = @transform_0, window_bounds = array<i64: 16, 32>}, {pipeline_mode = #tpu.pipeline_mode<synchronous>, transform_indices = @transform_1, window_bounds = array<i64: 16, 16>}, {pipeline_mode = #tpu.pipeline_mode<synchronous>, transform_indices = @transform_2, window_bounds = array<i64: 2, 32>}, {pipeline_mode = #tpu.pipeline_mode<synchronous>, transform_indices = @transform_3, window_bounds = array<i64: 2, 32, 96>}, {pipeline_mode = #tpu.pipeline_mode<synchronous>, transform_indices = @transform_4, window_bounds = array<i64: 2, 1, 96>}, {pipeline_mode = #tpu.pipeline_mode<synchronous>, transform_indices = @transform_5, window_bounds = array<i64: 2, 32, 32>}, {pipeline_mode = #tpu.pipeline_mode<synchronous>, transform_indices = @transform_6, window_bounds = array<i64: 2, 32, 64>}, {pipeline_mode = #tpu.pipeline_mode<synchronous>, transform_indices = @transform_7, window_bounds = array<i64: 2, 1, 64>}, {pipeline_mode = #tpu.pipeline_mode<synchronous>, transform_indices = @transform_8, window_bounds = array<i64: 2, 64, 32>}, {pipeline_mode = #tpu.pipeline_mode<synchronous>, transform_indices = @transform_9, window_bounds = array<i64: 2, 6, 32>}, {pipeline_mode = #tpu.pipeline_mode<synchronous>, transform_indices = @transform_10, window_bounds = array<i64: 32, 32>}, {pipeline_mode = #tpu.pipeline_mode<synchronous>, transform_indices = @transform_11, window_bounds = array<i64: 1, 32>}, {pipeline_mode = #tpu.pipeline_mode<synchronous>, transform_indices = @transform_12, window_bounds = array<i64: 32, 128>}, {pipeline_mode = #tpu.pipeline_mode<synchronous>, transform_indices = @transform_13, window_bounds = array<i64: 1, 128>}, {pipeline_mode = #tpu.pipeline_mode<synchronous>, transform_indices = @transform_14, window_bounds = array<i64: 2, 128>}]} {
    %0 = tpu.iota {dimensions = array<i32: 1>} : vector<1x32xi32>
    %c0_i32 = arith.constant 0 : i32
    %1 = vector.broadcast %c0_i32 : i32 to vector<1x32xi32>
    %2 = arith.cmpi sge, %0, %1 : vector<1x32xi32>
    %c16_i32 = arith.constant 16 : i32
    %3 = vector.broadcast %c16_i32 : i32 to vector<1x32xi32>
    %4 = arith.cmpi slt, %0, %3 : vector<1x32xi32>
    %5 = arith.andi %2, %4 : vector<1x32xi1>
    %6 = arith.extui %5 : vector<1x32xi1> to vector<1x32xi32>
    %7 = arith.sitofp %6 : vector<1x32xi32> to vector<1x32xf32>
    %c16_i32_0 = arith.constant 16 : i32
    %8 = vector.broadcast %c16_i32_0 : i32 to vector<1x32xi32>
    %9 = arith.cmpi sge, %0, %8 : vector<1x32xi32>
    %c32_i32 = arith.constant 32 : i32
    %10 = vector.broadcast %c32_i32 : i32 to vector<1x32xi32>
    %11 = arith.cmpi slt, %0, %10 : vector<1x32xi32>
    %12 = arith.andi %9, %11 : vector<1x32xi1>
    %13 = arith.extui %12 : vector<1x32xi1> to vector<1x32xi32>
    %14 = arith.sitofp %13 : vector<1x32xi32> to vector<1x32xf32>
    %c0 = arith.constant 0 : index
    %c0_1 = arith.constant 0 : index
    %15 = vector.load %arg2[%c0, %c0_1] : memref<16x16xf32, #tpu.memory_space<vmem>>, vector<16x16xf32>
    %c0_2 = arith.constant 0 : index
    %c0_3 = arith.constant 0 : index
    %16 = vector.load %arg1[%c0_2, %c0_3] : memref<16x32xf32, #tpu.memory_space<vmem>>, vector<16x32xf32>
    %c0_4 = arith.constant 0 : index
    %c0_5 = arith.constant 0 : index
    %17 = vector.load %arg3[%c0_4, %c0_5] : memref<2x32xf32, #tpu.memory_space<vmem>>, vector<1x32xf32>
    %c1 = arith.constant 1 : index
    %c0_6 = arith.constant 0 : index
    %18 = vector.load %arg3[%c1, %c0_6] : memref<2x32xf32, #tpu.memory_space<vmem>>, vector<1x32xf32>
    %cst = arith.constant dense<0.000000e+00> : vector<16xf32>
    %19 = vector.multi_reduction <add>, %16, %cst [1] : vector<16x32xf32> to vector<16xf32>
    %20 = vector.shape_cast %19 : vector<16xf32> to vector<16x1xf32>
    %cst_7 = arith.constant 3.200000e+01 : f32
    %21 = vector.broadcast %cst_7 : f32 to vector<16x1xf32>
    %22 = arith.divf %20, %21 : vector<16x1xf32>
    %23 = vector.broadcast %22 : vector<16x1xf32> to vector<16x32xf32>
    %24 = arith.subf %16, %23 : vector<16x32xf32>
    %25 = vector.broadcast %22 : vector<16x1xf32> to vector<16x32xf32>
    %26 = arith.subf %16, %25 : vector<16x32xf32>
    %27 = arith.mulf %24, %26 : vector<16x32xf32>
    %cst_8 = arith.constant dense<0.000000e+00> : vector<16xf32>
    %28 = vector.multi_reduction <add>, %27, %cst_8 [1] : vector<16x32xf32> to vector<16xf32>
    %29 = vector.shape_cast %28 : vector<16xf32> to vector<16x1xf32>
    %cst_9 = arith.constant 3.200000e+01 : f32
    %30 = vector.broadcast %cst_9 : f32 to vector<16x1xf32>
    %31 = arith.divf %29, %30 : vector<16x1xf32>
    %32 = vector.broadcast %22 : vector<16x1xf32> to vector<16x32xf32>
    %33 = arith.subf %16, %32 : vector<16x32xf32>
    %cst_10 = arith.constant 9.99999996E-13 : f32
    %34 = vector.broadcast %cst_10 : f32 to vector<16x1xf32>
    %35 = arith.addf %31, %34 : vector<16x1xf32>
    %36 = math.rsqrt %35 : vector<16x1xf32>
    %37 = vector.broadcast %36 : vector<16x1xf32> to vector<16x32xf32>
    %38 = arith.mulf %33, %37 : vector<16x32xf32>
    %39 = vector.broadcast %17 : vector<1x32xf32> to vector<16x32xf32>
    %40 = arith.mulf %38, %39 : vector<16x32xf32>
    %41 = vector.broadcast %18 : vector<1x32xf32> to vector<16x32xf32>
    %42 = arith.addf %40, %41 : vector<16x32xf32>
    %c0_11 = arith.constant 0 : index
    %c0_12 = arith.constant 0 : index
    %c0_13 = arith.constant 0 : index
    %43 = vector.load %arg10[%c0_11, %c0_12, %c0_13] : memref<2x6x32xf32, #tpu.memory_space<vmem>>, vector<1x6x32xf32>
    %44 = vector.shape_cast %43 : vector<1x6x32xf32> to vector<6x32xf32>
    %45 = vector.extract_strided_slice %44 {offsets = [0, 0], sizes = [1, 32], strides = [1, 1]} : vector<6x32xf32> to vector<1x32xf32>
    %46 = vector.extract_strided_slice %44 {offsets = [1, 0], sizes = [1, 32], strides = [1, 1]} : vector<6x32xf32> to vector<1x32xf32>
    %47 = vector.extract_strided_slice %44 {offsets = [2, 0], sizes = [1, 32], strides = [1, 1]} : vector<6x32xf32> to vector<1x32xf32>
    %48 = vector.extract_strided_slice %44 {offsets = [3, 0], sizes = [1, 32], strides = [1, 1]} : vector<6x32xf32> to vector<1x32xf32>
    %49 = vector.extract_strided_slice %44 {offsets = [4, 0], sizes = [1, 32], strides = [1, 1]} : vector<6x32xf32> to vector<1x32xf32>
    %50 = vector.extract_strided_slice %44 {offsets = [5, 0], sizes = [1, 32], strides = [1, 1]} : vector<6x32xf32> to vector<1x32xf32>
    %51 = arith.truncf %42 : vector<16x32xf32> to vector<16x32xbf16>
    %c0_14 = arith.constant 0 : index
    %c0_15 = arith.constant 0 : index
    %c0_16 = arith.constant 0 : index
    %52 = vector.load %arg4[%c0_14, %c0_15, %c0_16] : memref<2x32x96xbf16, #tpu.memory_space<vmem>>, vector<1x32x96xbf16>
    %53 = vector.shape_cast %52 : vector<1x32x96xbf16> to vector<32x96xbf16>
    %cst_17 = arith.constant dense<0.000000e+00> : vector<16x96xf32>
    %54 = tpu.matmul %51, %53, %cst_17 {dimension_numbers = #tpu.dot_dimension_numbers<[1], [0], [0], [1], [0, 0, 1, 1], [], []>} : vector<16x32xbf16>, vector<32x96xbf16>, vector<16x96xf32> -> vector<16x96xf32>
    %c0_18 = arith.constant 0 : index
    %c0_19 = arith.constant 0 : index
    %c0_20 = arith.constant 0 : index
    %55 = vector.load %arg5[%c0_18, %c0_19, %c0_20] : memref<2x1x96xf32, #tpu.memory_space<vmem>>, vector<1x1x96xf32>
    %56 = vector.shape_cast %55 : vector<1x1x96xf32> to vector<1x96xf32>
    %57 = vector.broadcast %56 : vector<1x96xf32> to vector<16x96xf32>
    %58 = arith.addf %54, %57 : vector<16x96xf32>
    %59 = vector.extract_strided_slice %58 {offsets = [0, 0], sizes = [16, 32], strides = [1, 1]} : vector<16x96xf32> to vector<16x32xf32>
    %60 = vector.extract_strided_slice %58 {offsets = [0, 32], sizes = [16, 32], strides = [1, 1]} : vector<16x96xf32> to vector<16x32xf32>
    %61 = vector.extract_strided_slice %58 {offsets = [0, 64], sizes = [16, 32], strides = [1, 1]} : vector<16x96xf32> to vector<16x32xf32>
    %cst_21 = arith.constant 0.000000e+00 : f32
    %62 = vector.broadcast %cst_21 : f32 to vector<16x32xf32>
    %63 = vector.broadcast %7 : vector<1x32xf32> to vector<16x32xf32>
    %64 = arith.mulf %59, %63 : vector<16x32xf32>
    %65 = arith.truncf %64 : vector<16x32xf32> to vector<16x32xbf16>
    %66 = arith.truncf %60 : vector<16x32xf32> to vector<16x32xbf16>
    "tpu.trace_start"() <{level = 10 : i32, message = "qd,kd->qk"}> : () -> ()
    %cst_22 = arith.constant dense<0.000000e+00> : vector<16x16xf32>
    %67 = tpu.matmul %65, %66, %cst_22 {dimension_numbers = #tpu.dot_dimension_numbers<[1], [1], [0], [0], [0, 0, 1, 0], [], []>} : vector<16x32xbf16>, vector<16x32xbf16>, vector<16x16xf32> -> vector<16x16xf32>
    "tpu.trace_stop"() : () -> ()
    %68 = arith.addf %67, %15 : vector<16x16xf32>
    %cst_23 = arith.constant dense<0xFF800000> : vector<16xf32>
    %69 = vector.multi_reduction <maximumf>, %68, %cst_23 [1] : vector<16x16xf32> to vector<16xf32>
    %70 = vector.shape_cast %69 : vector<16xf32> to vector<16x1xf32>
    %71 = vector.broadcast %70 : vector<16x1xf32> to vector<16x16xf32>
    %72 = arith.subf %68, %71 : vector<16x16xf32>
    %73 = math.exp %72 : vector<16x16xf32>
    %cst_24 = arith.constant dense<0.000000e+00> : vector<16xf32>
    %74 = vector.multi_reduction <add>, %73, %cst_24 [1] : vector<16x16xf32> to vector<16xf32>
    %75 = vector.shape_cast %74 : vector<16xf32> to vector<16x1xf32>
    %76 = tpu.reciprocal %75 {approx = true} : vector<16x1xf32> -> vector<16x1xf32>
    %77 = vector.broadcast %76 : vector<16x1xf32> to vector<16x16xf32>
    %78 = arith.mulf %73, %77 : vector<16x16xf32>
    %79 = arith.truncf %78 : vector<16x16xf32> to vector<16x16xbf16>
    %80 = vector.broadcast %7 : vector<1x32xf32> to vector<16x32xf32>
    %81 = arith.mulf %61, %80 : vector<16x32xf32>
    %82 = arith.truncf %81 : vector<16x32xf32> to vector<16x32xbf16>
    %cst_25 = arith.constant dense<0.000000e+00> : vector<16x32xf32>
    %83 = tpu.matmul %79, %82, %cst_25 {dimension_numbers = #tpu.dot_dimension_numbers<[1], [0], [0], [1], [0, 0, 1, 1], [], []>} : vector<16x16xbf16>, vector<16x32xbf16>, vector<16x32xf32> -> vector<16x32xf32>
    %84 = arith.addf %62, %83 : vector<16x32xf32>
    %85 = vector.broadcast %14 : vector<1x32xf32> to vector<16x32xf32>
    %86 = arith.mulf %59, %85 : vector<16x32xf32>
    %87 = arith.truncf %86 : vector<16x32xf32> to vector<16x32xbf16>
    %88 = arith.truncf %60 : vector<16x32xf32> to vector<16x32xbf16>
    "tpu.trace_start"() <{level = 10 : i32, message = "qd,kd->qk"}> : () -> ()
    %cst_26 = arith.constant dense<0.000000e+00> : vector<16x16xf32>
    %89 = tpu.matmul %87, %88, %cst_26 {dimension_numbers = #tpu.dot_dimension_numbers<[1], [1], [0], [0], [0, 0, 1, 0], [], []>} : vector<16x32xbf16>, vector<16x32xbf16>, vector<16x16xf32> -> vector<16x16xf32>
    "tpu.trace_stop"() : () -> ()
    %90 = arith.addf %89, %15 : vector<16x16xf32>
    %cst_27 = arith.constant dense<0xFF800000> : vector<16xf32>
    %91 = vector.multi_reduction <maximumf>, %90, %cst_27 [1] : vector<16x16xf32> to vector<16xf32>
    %92 = vector.shape_cast %91 : vector<16xf32> to vector<16x1xf32>
    %93 = vector.broadcast %92 : vector<16x1xf32> to vector<16x16xf32>
    %94 = arith.subf %90, %93 : vector<16x16xf32>
    %95 = math.exp %94 : vector<16x16xf32>
    %cst_28 = arith.constant dense<0.000000e+00> : vector<16xf32>
    %96 = vector.multi_reduction <add>, %95, %cst_28 [1] : vector<16x16xf32> to vector<16xf32>
    %97 = vector.shape_cast %96 : vector<16xf32> to vector<16x1xf32>
    %98 = tpu.reciprocal %97 {approx = true} : vector<16x1xf32> -> vector<16x1xf32>
    %99 = vector.broadcast %98 : vector<16x1xf32> to vector<16x16xf32>
    %100 = arith.mulf %95, %99 : vector<16x16xf32>
    %101 = arith.truncf %100 : vector<16x16xf32> to vector<16x16xbf16>
    %102 = vector.broadcast %14 : vector<1x32xf32> to vector<16x32xf32>
    %103 = arith.mulf %61, %102 : vector<16x32xf32>
    %104 = arith.truncf %103 : vector<16x32xf32> to vector<16x32xbf16>
    %cst_29 = arith.constant dense<0.000000e+00> : vector<16x32xf32>
    %105 = tpu.matmul %101, %104, %cst_29 {dimension_numbers = #tpu.dot_dimension_numbers<[1], [0], [0], [1], [0, 0, 1, 1], [], []>} : vector<16x16xbf16>, vector<16x32xbf16>, vector<16x32xf32> -> vector<16x32xf32>
    %106 = arith.addf %84, %105 : vector<16x32xf32>
    %107 = arith.truncf %106 : vector<16x32xf32> to vector<16x32xbf16>
    %c0_30 = arith.constant 0 : index
    %c0_31 = arith.constant 0 : index
    %c0_32 = arith.constant 0 : index
    %108 = vector.load %arg6[%c0_30, %c0_31, %c0_32] : memref<2x32x32xbf16, #tpu.memory_space<vmem>>, vector<1x32x32xbf16>
    %109 = vector.shape_cast %108 : vector<1x32x32xbf16> to vector<32x32xbf16>
    %cst_33 = arith.constant dense<0.000000e+00> : vector<16x32xf32>
    %110 = tpu.matmul %107, %109, %cst_33 {dimension_numbers = #tpu.dot_dimension_numbers<[1], [0], [0], [1], [0, 0, 1, 1], [], []>} : vector<16x32xbf16>, vector<32x32xbf16>, vector<16x32xf32> -> vector<16x32xf32>
    %111 = vector.broadcast %45 : vector<1x32xf32> to vector<16x32xf32>
    %112 = arith.addf %110, %111 : vector<16x32xf32>
    %113 = arith.addf %112, %42 : vector<16x32xf32>
    %cst_34 = arith.constant dense<0.000000e+00> : vector<16xf32>
    %114 = vector.multi_reduction <add>, %113, %cst_34 [1] : vector<16x32xf32> to vector<16xf32>
    %115 = vector.shape_cast %114 : vector<16xf32> to vector<16x1xf32>
    %cst_35 = arith.constant 3.200000e+01 : f32
    %116 = vector.broadcast %cst_35 : f32 to vector<16x1xf32>
    %117 = arith.divf %115, %116 : vector<16x1xf32>
    %118 = vector.broadcast %117 : vector<16x1xf32> to vector<16x32xf32>
    %119 = arith.subf %113, %118 : vector<16x32xf32>
    %120 = vector.broadcast %117 : vector<16x1xf32> to vector<16x32xf32>
    %121 = arith.subf %113, %120 : vector<16x32xf32>
    %122 = arith.mulf %119, %121 : vector<16x32xf32>
    %cst_36 = arith.constant dense<0.000000e+00> : vector<16xf32>
    %123 = vector.multi_reduction <add>, %122, %cst_36 [1] : vector<16x32xf32> to vector<16xf32>
    %124 = vector.shape_cast %123 : vector<16xf32> to vector<16x1xf32>
    %cst_37 = arith.constant 3.200000e+01 : f32
    %125 = vector.broadcast %cst_37 : f32 to vector<16x1xf32>
    %126 = arith.divf %124, %125 : vector<16x1xf32>
    %127 = vector.broadcast %117 : vector<16x1xf32> to vector<16x32xf32>
    %128 = arith.subf %113, %127 : vector<16x32xf32>
    %cst_38 = arith.constant 9.99999996E-13 : f32
    %129 = vector.broadcast %cst_38 : f32 to vector<16x1xf32>
    %130 = arith.addf %126, %129 : vector<16x1xf32>
    %131 = math.rsqrt %130 : vector<16x1xf32>
    %132 = vector.broadcast %131 : vector<16x1xf32> to vector<16x32xf32>
    %133 = arith.mulf %128, %132 : vector<16x32xf32>
    %134 = vector.broadcast %46 : vector<1x32xf32> to vector<16x32xf32>
    %135 = arith.mulf %133, %134 : vector<16x32xf32>
    %136 = vector.broadcast %47 : vector<1x32xf32> to vector<16x32xf32>
    %137 = arith.addf %135, %136 : vector<16x32xf32>
    %138 = arith.truncf %137 : vector<16x32xf32> to vector<16x32xbf16>
    %c0_39 = arith.constant 0 : index
    %c0_40 = arith.constant 0 : index
    %c0_41 = arith.constant 0 : index
    %139 = vector.load %arg7[%c0_39, %c0_40, %c0_41] : memref<2x32x64xbf16, #tpu.memory_space<vmem>>, vector<1x32x64xbf16>
    %140 = vector.shape_cast %139 : vector<1x32x64xbf16> to vector<32x64xbf16>
    %cst_42 = arith.constant dense<0.000000e+00> : vector<16x64xf32>
    %141 = tpu.matmul %138, %140, %cst_42 {dimension_numbers = #tpu.dot_dimension_numbers<[1], [0], [0], [1], [0, 0, 1, 1], [], []>} : vector<16x32xbf16>, vector<32x64xbf16>, vector<16x64xf32> -> vector<16x64xf32>
    %c0_43 = arith.constant 0 : index
    %c0_44 = arith.constant 0 : index
    %c0_45 = arith.constant 0 : index
    %142 = vector.load %arg8[%c0_43, %c0_44, %c0_45] : memref<2x1x64xf32, #tpu.memory_space<vmem>>, vector<1x1x64xf32>
    %143 = vector.shape_cast %142 : vector<1x1x64xf32> to vector<1x64xf32>
    %144 = vector.broadcast %143 : vector<1x64xf32> to vector<16x64xf32>
    %145 = arith.addf %141, %144 : vector<16x64xf32>
    %cst_46 = arith.constant 5.000000e-01 : f32
    %146 = vector.broadcast %cst_46 : f32 to vector<16x64xf32>
    %147 = arith.mulf %146, %145 : vector<16x64xf32>
    %cst_47 = arith.constant 4.471500e-02 : f32
    %148 = vector.broadcast %cst_47 : f32 to vector<16x64xf32>
    %149 = arith.mulf %148, %145 : vector<16x64xf32>
    %150 = arith.mulf %149, %145 : vector<16x64xf32>
    %151 = arith.mulf %150, %145 : vector<16x64xf32>
    %152 = arith.addf %145, %151 : vector<16x64xf32>
    %cst_48 = arith.constant 0.797884583 : f32
    %153 = vector.broadcast %cst_48 : f32 to vector<16x64xf32>
    %154 = arith.mulf %153, %152 : vector<16x64xf32>
    %155 = math.tanh %154 : vector<16x64xf32>
    %cst_49 = arith.constant 1.000000e+00 : f32
    %156 = vector.broadcast %cst_49 : f32 to vector<16x64xf32>
    %157 = arith.addf %156, %155 : vector<16x64xf32>
    %158 = arith.mulf %147, %157 : vector<16x64xf32>
    %159 = arith.truncf %158 : vector<16x64xf32> to vector<16x64xbf16>
    %c0_50 = arith.constant 0 : index
    %c0_51 = arith.constant 0 : index
    %c0_52 = arith.constant 0 : index
    %160 = vector.load %arg9[%c0_50, %c0_51, %c0_52] : memref<2x64x32xbf16, #tpu.memory_space<vmem>>, vector<1x64x32xbf16>
    %161 = vector.shape_cast %160 : vector<1x64x32xbf16> to vector<64x32xbf16>
    %cst_53 = arith.constant dense<0.000000e+00> : vector<16x32xf32>
    %162 = tpu.matmul %159, %161, %cst_53 {dimension_numbers = #tpu.dot_dimension_numbers<[1], [0], [0], [1], [0, 0, 1, 1], [], []>} : vector<16x64xbf16>, vector<64x32xbf16>, vector<16x32xf32> -> vector<16x32xf32>
    %163 = vector.broadcast %48 : vector<1x32xf32> to vector<16x32xf32>
    %164 = arith.addf %162, %163 : vector<16x32xf32>
    %165 = arith.addf %164, %137 : vector<16x32xf32>
    %cst_54 = arith.constant dense<0.000000e+00> : vector<16xf32>
    %166 = vector.multi_reduction <add>, %165, %cst_54 [1] : vector<16x32xf32> to vector<16xf32>
    %167 = vector.shape_cast %166 : vector<16xf32> to vector<16x1xf32>
    %cst_55 = arith.constant 3.200000e+01 : f32
    %168 = vector.broadcast %cst_55 : f32 to vector<16x1xf32>
    %169 = arith.divf %167, %168 : vector<16x1xf32>
    %170 = vector.broadcast %169 : vector<16x1xf32> to vector<16x32xf32>
    %171 = arith.subf %165, %170 : vector<16x32xf32>
    %172 = vector.broadcast %169 : vector<16x1xf32> to vector<16x32xf32>
    %173 = arith.subf %165, %172 : vector<16x32xf32>
    %174 = arith.mulf %171, %173 : vector<16x32xf32>
    %cst_56 = arith.constant dense<0.000000e+00> : vector<16xf32>
    %175 = vector.multi_reduction <add>, %174, %cst_56 [1] : vector<16x32xf32> to vector<16xf32>
    %176 = vector.shape_cast %175 : vector<16xf32> to vector<16x1xf32>
    %cst_57 = arith.constant 3.200000e+01 : f32
    %177 = vector.broadcast %cst_57 : f32 to vector<16x1xf32>
    %178 = arith.divf %176, %177 : vector<16x1xf32>
    %179 = vector.broadcast %169 : vector<16x1xf32> to vector<16x32xf32>
    %180 = arith.subf %165, %179 : vector<16x32xf32>
    %cst_58 = arith.constant 9.99999996E-13 : f32
    %181 = vector.broadcast %cst_58 : f32 to vector<16x1xf32>
    %182 = arith.addf %178, %181 : vector<16x1xf32>
    %183 = math.rsqrt %182 : vector<16x1xf32>
    %184 = vector.broadcast %183 : vector<16x1xf32> to vector<16x32xf32>
    %185 = arith.mulf %180, %184 : vector<16x32xf32>
    %186 = vector.broadcast %49 : vector<1x32xf32> to vector<16x32xf32>
    %187 = arith.mulf %185, %186 : vector<16x32xf32>
    %188 = vector.broadcast %50 : vector<1x32xf32> to vector<16x32xf32>
    %189 = arith.addf %187, %188 : vector<16x32xf32>
    %c1_59 = arith.constant 1 : index
    %c0_60 = arith.constant 0 : index
    %c0_61 = arith.constant 0 : index
    %190 = vector.load %arg10[%c1_59, %c0_60, %c0_61] : memref<2x6x32xf32, #tpu.memory_space<vmem>>, vector<1x6x32xf32>
    %191 = vector.shape_cast %190 : vector<1x6x32xf32> to vector<6x32xf32>
    %192 = vector.extract_strided_slice %191 {offsets = [0, 0], sizes = [1, 32], strides = [1, 1]} : vector<6x32xf32> to vector<1x32xf32>
    %193 = vector.extract_strided_slice %191 {offsets = [1, 0], sizes = [1, 32], strides = [1, 1]} : vector<6x32xf32> to vector<1x32xf32>
    %194 = vector.extract_strided_slice %191 {offsets = [2, 0], sizes = [1, 32], strides = [1, 1]} : vector<6x32xf32> to vector<1x32xf32>
    %195 = vector.extract_strided_slice %191 {offsets = [3, 0], sizes = [1, 32], strides = [1, 1]} : vector<6x32xf32> to vector<1x32xf32>
    %196 = vector.extract_strided_slice %191 {offsets = [4, 0], sizes = [1, 32], strides = [1, 1]} : vector<6x32xf32> to vector<1x32xf32>
    %197 = vector.extract_strided_slice %191 {offsets = [5, 0], sizes = [1, 32], strides = [1, 1]} : vector<6x32xf32> to vector<1x32xf32>
    %198 = arith.truncf %189 : vector<16x32xf32> to vector<16x32xbf16>
    %c1_62 = arith.constant 1 : index
    %c0_63 = arith.constant 0 : index
    %c0_64 = arith.constant 0 : index
    %199 = vector.load %arg4[%c1_62, %c0_63, %c0_64] : memref<2x32x96xbf16, #tpu.memory_space<vmem>>, vector<1x32x96xbf16>
    %200 = vector.shape_cast %199 : vector<1x32x96xbf16> to vector<32x96xbf16>
    %cst_65 = arith.constant dense<0.000000e+00> : vector<16x96xf32>
    %201 = tpu.matmul %198, %200, %cst_65 {dimension_numbers = #tpu.dot_dimension_numbers<[1], [0], [0], [1], [0, 0, 1, 1], [], []>} : vector<16x32xbf16>, vector<32x96xbf16>, vector<16x96xf32> -> vector<16x96xf32>
    %c1_66 = arith.constant 1 : index
    %c0_67 = arith.constant 0 : index
    %c0_68 = arith.constant 0 : index
    %202 = vector.load %arg5[%c1_66, %c0_67, %c0_68] : memref<2x1x96xf32, #tpu.memory_space<vmem>>, vector<1x1x96xf32>
    %203 = vector.shape_cast %202 : vector<1x1x96xf32> to vector<1x96xf32>
    %204 = vector.broadcast %203 : vector<1x96xf32> to vector<16x96xf32>
    %205 = arith.addf %201, %204 : vector<16x96xf32>
    %206 = vector.extract_strided_slice %205 {offsets = [0, 0], sizes = [16, 32], strides = [1, 1]} : vector<16x96xf32> to vector<16x32xf32>
    %207 = vector.extract_strided_slice %205 {offsets = [0, 32], sizes = [16, 32], strides = [1, 1]} : vector<16x96xf32> to vector<16x32xf32>
    %208 = vector.extract_strided_slice %205 {offsets = [0, 64], sizes = [16, 32], strides = [1, 1]} : vector<16x96xf32> to vector<16x32xf32>
    %cst_69 = arith.constant 0.000000e+00 : f32
    %209 = vector.broadcast %cst_69 : f32 to vector<16x32xf32>
    %210 = vector.broadcast %7 : vector<1x32xf32> to vector<16x32xf32>
    %211 = arith.mulf %206, %210 : vector<16x32xf32>
    %212 = arith.truncf %211 : vector<16x32xf32> to vector<16x32xbf16>
    %213 = arith.truncf %207 : vector<16x32xf32> to vector<16x32xbf16>
    "tpu.trace_start"() <{level = 10 : i32, message = "qd,kd->qk"}> : () -> ()
    %cst_70 = arith.constant dense<0.000000e+00> : vector<16x16xf32>
    %214 = tpu.matmul %212, %213, %cst_70 {dimension_numbers = #tpu.dot_dimension_numbers<[1], [1], [0], [0], [0, 0, 1, 0], [], []>} : vector<16x32xbf16>, vector<16x32xbf16>, vector<16x16xf32> -> vector<16x16xf32>
    "tpu.trace_stop"() : () -> ()
    %215 = arith.addf %214, %15 : vector<16x16xf32>
    %cst_71 = arith.constant dense<0xFF800000> : vector<16xf32>
    %216 = vector.multi_reduction <maximumf>, %215, %cst_71 [1] : vector<16x16xf32> to vector<16xf32>
    %217 = vector.shape_cast %216 : vector<16xf32> to vector<16x1xf32>
    %218 = vector.broadcast %217 : vector<16x1xf32> to vector<16x16xf32>
    %219 = arith.subf %215, %218 : vector<16x16xf32>
    %220 = math.exp %219 : vector<16x16xf32>
    %cst_72 = arith.constant dense<0.000000e+00> : vector<16xf32>
    %221 = vector.multi_reduction <add>, %220, %cst_72 [1] : vector<16x16xf32> to vector<16xf32>
    %222 = vector.shape_cast %221 : vector<16xf32> to vector<16x1xf32>
    %223 = tpu.reciprocal %222 {approx = true} : vector<16x1xf32> -> vector<16x1xf32>
    %224 = vector.broadcast %223 : vector<16x1xf32> to vector<16x16xf32>
    %225 = arith.mulf %220, %224 : vector<16x16xf32>
    %226 = arith.truncf %225 : vector<16x16xf32> to vector<16x16xbf16>
    %227 = vector.broadcast %7 : vector<1x32xf32> to vector<16x32xf32>
    %228 = arith.mulf %208, %227 : vector<16x32xf32>
    %229 = arith.truncf %228 : vector<16x32xf32> to vector<16x32xbf16>
    %cst_73 = arith.constant dense<0.000000e+00> : vector<16x32xf32>
    %230 = tpu.matmul %226, %229, %cst_73 {dimension_numbers = #tpu.dot_dimension_numbers<[1], [0], [0], [1], [0, 0, 1, 1], [], []>} : vector<16x16xbf16>, vector<16x32xbf16>, vector<16x32xf32> -> vector<16x32xf32>
    %231 = arith.addf %209, %230 : vector<16x32xf32>
    %232 = vector.broadcast %14 : vector<1x32xf32> to vector<16x32xf32>
    %233 = arith.mulf %206, %232 : vector<16x32xf32>
    %234 = arith.truncf %233 : vector<16x32xf32> to vector<16x32xbf16>
    %235 = arith.truncf %207 : vector<16x32xf32> to vector<16x32xbf16>
    "tpu.trace_start"() <{level = 10 : i32, message = "qd,kd->qk"}> : () -> ()
    %cst_74 = arith.constant dense<0.000000e+00> : vector<16x16xf32>
    %236 = tpu.matmul %234, %235, %cst_74 {dimension_numbers = #tpu.dot_dimension_numbers<[1], [1], [0], [0], [0, 0, 1, 0], [], []>} : vector<16x32xbf16>, vector<16x32xbf16>, vector<16x16xf32> -> vector<16x16xf32>
    "tpu.trace_stop"() : () -> ()
    %237 = arith.addf %236, %15 : vector<16x16xf32>
    %cst_75 = arith.constant dense<0xFF800000> : vector<16xf32>
    %238 = vector.multi_reduction <maximumf>, %237, %cst_75 [1] : vector<16x16xf32> to vector<16xf32>
    %239 = vector.shape_cast %238 : vector<16xf32> to vector<16x1xf32>
    %240 = vector.broadcast %239 : vector<16x1xf32> to vector<16x16xf32>
    %241 = arith.subf %237, %240 : vector<16x16xf32>
    %242 = math.exp %241 : vector<16x16xf32>
    %cst_76 = arith.constant dense<0.000000e+00> : vector<16xf32>
    %243 = vector.multi_reduction <add>, %242, %cst_76 [1] : vector<16x16xf32> to vector<16xf32>
    %244 = vector.shape_cast %243 : vector<16xf32> to vector<16x1xf32>
    %245 = tpu.reciprocal %244 {approx = true} : vector<16x1xf32> -> vector<16x1xf32>
    %246 = vector.broadcast %245 : vector<16x1xf32> to vector<16x16xf32>
    %247 = arith.mulf %242, %246 : vector<16x16xf32>
    %248 = arith.truncf %247 : vector<16x16xf32> to vector<16x16xbf16>
    %249 = vector.broadcast %14 : vector<1x32xf32> to vector<16x32xf32>
    %250 = arith.mulf %208, %249 : vector<16x32xf32>
    %251 = arith.truncf %250 : vector<16x32xf32> to vector<16x32xbf16>
    %cst_77 = arith.constant dense<0.000000e+00> : vector<16x32xf32>
    %252 = tpu.matmul %248, %251, %cst_77 {dimension_numbers = #tpu.dot_dimension_numbers<[1], [0], [0], [1], [0, 0, 1, 1], [], []>} : vector<16x16xbf16>, vector<16x32xbf16>, vector<16x32xf32> -> vector<16x32xf32>
    %253 = arith.addf %231, %252 : vector<16x32xf32>
    %254 = arith.truncf %253 : vector<16x32xf32> to vector<16x32xbf16>
    %c1_78 = arith.constant 1 : index
    %c0_79 = arith.constant 0 : index
    %c0_80 = arith.constant 0 : index
    %255 = vector.load %arg6[%c1_78, %c0_79, %c0_80] : memref<2x32x32xbf16, #tpu.memory_space<vmem>>, vector<1x32x32xbf16>
    %256 = vector.shape_cast %255 : vector<1x32x32xbf16> to vector<32x32xbf16>
    %cst_81 = arith.constant dense<0.000000e+00> : vector<16x32xf32>
    %257 = tpu.matmul %254, %256, %cst_81 {dimension_numbers = #tpu.dot_dimension_numbers<[1], [0], [0], [1], [0, 0, 1, 1], [], []>} : vector<16x32xbf16>, vector<32x32xbf16>, vector<16x32xf32> -> vector<16x32xf32>
    %258 = vector.broadcast %192 : vector<1x32xf32> to vector<16x32xf32>
    %259 = arith.addf %257, %258 : vector<16x32xf32>
    %260 = arith.addf %259, %189 : vector<16x32xf32>
    %cst_82 = arith.constant dense<0.000000e+00> : vector<16xf32>
    %261 = vector.multi_reduction <add>, %260, %cst_82 [1] : vector<16x32xf32> to vector<16xf32>
    %262 = vector.shape_cast %261 : vector<16xf32> to vector<16x1xf32>
    %cst_83 = arith.constant 3.200000e+01 : f32
    %263 = vector.broadcast %cst_83 : f32 to vector<16x1xf32>
    %264 = arith.divf %262, %263 : vector<16x1xf32>
    %265 = vector.broadcast %264 : vector<16x1xf32> to vector<16x32xf32>
    %266 = arith.subf %260, %265 : vector<16x32xf32>
    %267 = vector.broadcast %264 : vector<16x1xf32> to vector<16x32xf32>
    %268 = arith.subf %260, %267 : vector<16x32xf32>
    %269 = arith.mulf %266, %268 : vector<16x32xf32>
    %cst_84 = arith.constant dense<0.000000e+00> : vector<16xf32>
    %270 = vector.multi_reduction <add>, %269, %cst_84 [1] : vector<16x32xf32> to vector<16xf32>
    %271 = vector.shape_cast %270 : vector<16xf32> to vector<16x1xf32>
    %cst_85 = arith.constant 3.200000e+01 : f32
    %272 = vector.broadcast %cst_85 : f32 to vector<16x1xf32>
    %273 = arith.divf %271, %272 : vector<16x1xf32>
    %274 = vector.broadcast %264 : vector<16x1xf32> to vector<16x32xf32>
    %275 = arith.subf %260, %274 : vector<16x32xf32>
    %cst_86 = arith.constant 9.99999996E-13 : f32
    %276 = vector.broadcast %cst_86 : f32 to vector<16x1xf32>
    %277 = arith.addf %273, %276 : vector<16x1xf32>
    %278 = math.rsqrt %277 : vector<16x1xf32>
    %279 = vector.broadcast %278 : vector<16x1xf32> to vector<16x32xf32>
    %280 = arith.mulf %275, %279 : vector<16x32xf32>
    %281 = vector.broadcast %193 : vector<1x32xf32> to vector<16x32xf32>
    %282 = arith.mulf %280, %281 : vector<16x32xf32>
    %283 = vector.broadcast %194 : vector<1x32xf32> to vector<16x32xf32>
    %284 = arith.addf %282, %283 : vector<16x32xf32>
    %285 = arith.truncf %284 : vector<16x32xf32> to vector<16x32xbf16>
    %c1_87 = arith.constant 1 : index
    %c0_88 = arith.constant 0 : index
    %c0_89 = arith.constant 0 : index
    %286 = vector.load %arg7[%c1_87, %c0_88, %c0_89] : memref<2x32x64xbf16, #tpu.memory_space<vmem>>, vector<1x32x64xbf16>
    %287 = vector.shape_cast %286 : vector<1x32x64xbf16> to vector<32x64xbf16>
    %cst_90 = arith.constant dense<0.000000e+00> : vector<16x64xf32>
    %288 = tpu.matmul %285, %287, %cst_90 {dimension_numbers = #tpu.dot_dimension_numbers<[1], [0], [0], [1], [0, 0, 1, 1], [], []>} : vector<16x32xbf16>, vector<32x64xbf16>, vector<16x64xf32> -> vector<16x64xf32>
    %c1_91 = arith.constant 1 : index
    %c0_92 = arith.constant 0 : index
    %c0_93 = arith.constant 0 : index
    %289 = vector.load %arg8[%c1_91, %c0_92, %c0_93] : memref<2x1x64xf32, #tpu.memory_space<vmem>>, vector<1x1x64xf32>
    %290 = vector.shape_cast %289 : vector<1x1x64xf32> to vector<1x64xf32>
    %291 = vector.broadcast %290 : vector<1x64xf32> to vector<16x64xf32>
    %292 = arith.addf %288, %291 : vector<16x64xf32>
    %cst_94 = arith.constant 5.000000e-01 : f32
    %293 = vector.broadcast %cst_94 : f32 to vector<16x64xf32>
    %294 = arith.mulf %293, %292 : vector<16x64xf32>
    %cst_95 = arith.constant 4.471500e-02 : f32
    %295 = vector.broadcast %cst_95 : f32 to vector<16x64xf32>
    %296 = arith.mulf %295, %292 : vector<16x64xf32>
    %297 = arith.mulf %296, %292 : vector<16x64xf32>
    %298 = arith.mulf %297, %292 : vector<16x64xf32>
    %299 = arith.addf %292, %298 : vector<16x64xf32>
    %cst_96 = arith.constant 0.797884583 : f32
    %300 = vector.broadcast %cst_96 : f32 to vector<16x64xf32>
    %301 = arith.mulf %300, %299 : vector<16x64xf32>
    %302 = math.tanh %301 : vector<16x64xf32>
    %cst_97 = arith.constant 1.000000e+00 : f32
    %303 = vector.broadcast %cst_97 : f32 to vector<16x64xf32>
    %304 = arith.addf %303, %302 : vector<16x64xf32>
    %305 = arith.mulf %294, %304 : vector<16x64xf32>
    %306 = arith.truncf %305 : vector<16x64xf32> to vector<16x64xbf16>
    %c1_98 = arith.constant 1 : index
    %c0_99 = arith.constant 0 : index
    %c0_100 = arith.constant 0 : index
    %307 = vector.load %arg9[%c1_98, %c0_99, %c0_100] : memref<2x64x32xbf16, #tpu.memory_space<vmem>>, vector<1x64x32xbf16>
    %308 = vector.shape_cast %307 : vector<1x64x32xbf16> to vector<64x32xbf16>
    %cst_101 = arith.constant dense<0.000000e+00> : vector<16x32xf32>
    %309 = tpu.matmul %306, %308, %cst_101 {dimension_numbers = #tpu.dot_dimension_numbers<[1], [0], [0], [1], [0, 0, 1, 1], [], []>} : vector<16x64xbf16>, vector<64x32xbf16>, vector<16x32xf32> -> vector<16x32xf32>
    %310 = vector.broadcast %195 : vector<1x32xf32> to vector<16x32xf32>
    %311 = arith.addf %309, %310 : vector<16x32xf32>
    %312 = arith.addf %311, %284 : vector<16x32xf32>
    %cst_102 = arith.constant dense<0.000000e+00> : vector<16xf32>
    %313 = vector.multi_reduction <add>, %312, %cst_102 [1] : vector<16x32xf32> to vector<16xf32>
    %314 = vector.shape_cast %313 : vector<16xf32> to vector<16x1xf32>
    %cst_103 = arith.constant 3.200000e+01 : f32
    %315 = vector.broadcast %cst_103 : f32 to vector<16x1xf32>
    %316 = arith.divf %314, %315 : vector<16x1xf32>
    %317 = vector.broadcast %316 : vector<16x1xf32> to vector<16x32xf32>
    %318 = arith.subf %312, %317 : vector<16x32xf32>
    %319 = vector.broadcast %316 : vector<16x1xf32> to vector<16x32xf32>
    %320 = arith.subf %312, %319 : vector<16x32xf32>
    %321 = arith.mulf %318, %320 : vector<16x32xf32>
    %cst_104 = arith.constant dense<0.000000e+00> : vector<16xf32>
    %322 = vector.multi_reduction <add>, %321, %cst_104 [1] : vector<16x32xf32> to vector<16xf32>
    %323 = vector.shape_cast %322 : vector<16xf32> to vector<16x1xf32>
    %cst_105 = arith.constant 3.200000e+01 : f32
    %324 = vector.broadcast %cst_105 : f32 to vector<16x1xf32>
    %325 = arith.divf %323, %324 : vector<16x1xf32>
    %326 = vector.broadcast %316 : vector<16x1xf32> to vector<16x32xf32>
    %327 = arith.subf %312, %326 : vector<16x32xf32>
    %cst_106 = arith.constant 9.99999996E-13 : f32
    %328 = vector.broadcast %cst_106 : f32 to vector<16x1xf32>
    %329 = arith.addf %325, %328 : vector<16x1xf32>
    %330 = math.rsqrt %329 : vector<16x1xf32>
    %331 = vector.broadcast %330 : vector<16x1xf32> to vector<16x32xf32>
    %332 = arith.mulf %327, %331 : vector<16x32xf32>
    %333 = vector.broadcast %196 : vector<1x32xf32> to vector<16x32xf32>
    %334 = arith.mulf %332, %333 : vector<16x32xf32>
    %335 = vector.broadcast %197 : vector<1x32xf32> to vector<16x32xf32>
    %336 = arith.addf %334, %335 : vector<16x32xf32>
    %337 = vector.extract_strided_slice %336 {offsets = [0, 0], sizes = [1, 32], strides = [1, 1]} : vector<16x32xf32> to vector<1x32xf32>
    %338 = vector.extract_strided_slice %336 {offsets = [8, 0], sizes = [1, 32], strides = [1, 1]} : vector<16x32xf32> to vector<1x32xf32>
    %339 = tpu.concatenate %337, %338 in 0 : vector<1x32xf32>, vector<1x32xf32> -> vector<2x32xf32>
    %340 = arith.truncf %339 : vector<2x32xf32> to vector<2x32xbf16>
    %c0_107 = arith.constant 0 : index
    %c0_108 = arith.constant 0 : index
    %341 = vector.load %arg11[%c0_107, %c0_108] : memref<32x32xbf16, #tpu.memory_space<vmem>>, vector<32x32xbf16>
    %cst_109 = arith.constant dense<0.000000e+00> : vector<2x32xf32>
    %342 = tpu.matmul %340, %341, %cst_109 {dimension_numbers = #tpu.dot_dimension_numbers<[1], [0], [0], [1], [0, 0, 1, 1], [], []>} : vector<2x32xbf16>, vector<32x32xbf16>, vector<2x32xf32> -> vector<2x32xf32>
    %c0_110 = arith.constant 0 : index
    %c0_111 = arith.constant 0 : index
    %343 = vector.load %arg12[%c0_110, %c0_111] : memref<1x32xf32, #tpu.memory_space<vmem>>, vector<1x32xf32>
    %344 = vector.broadcast %343 : vector<1x32xf32> to vector<2x32xf32>
    %345 = arith.addf %342, %344 : vector<2x32xf32>
    %346 = math.tanh %345 : vector<2x32xf32>
    %347 = arith.truncf %346 : vector<2x32xf32> to vector<2x32xbf16>
    %c0_112 = arith.constant 0 : index
    %c0_113 = arith.constant 0 : index
    %348 = vector.load %arg13[%c0_112, %c0_113] : memref<32x128xbf16, #tpu.memory_space<vmem>>, vector<32x128xbf16>
    %cst_114 = arith.constant dense<0.000000e+00> : vector<2x128xf32>
    %349 = tpu.matmul %347, %348, %cst_114 {dimension_numbers = #tpu.dot_dimension_numbers<[1], [0], [0], [1], [0, 0, 1, 1], [], []>} : vector<2x32xbf16>, vector<32x128xbf16>, vector<2x128xf32> -> vector<2x128xf32>
    %c0_115 = arith.constant 0 : index
    %c0_116 = arith.constant 0 : index
    %350 = vector.load %arg14[%c0_115, %c0_116] : memref<1x128xf32, #tpu.memory_space<vmem>>, vector<1x128xf32>
    %351 = vector.broadcast %350 : vector<1x128xf32> to vector<2x128xf32>
    %352 = arith.addf %349, %351 : vector<2x128xf32>
    %c0_117 = arith.constant 0 : index
    %c0_118 = arith.constant 0 : index
    %353 = vector.load %arg15[%c0_117, %c0_118] : memref<2x128xf32, #tpu.memory_space<vmem>>, vector<2x128xf32>
    tpu.vector_store %arg15[%c0_117, %c0_118], %352 {strides = array<i32>} : memref<2x128xf32, #tpu.memory_space<vmem>>, vector<2x128xf32>,
    return
  }
  func.func @transform_0(%arg0: i32) -> (i32, i32) {
    %c0_i32 = arith.constant 0 : i32
    %c0_i32_0 = arith.constant 0 : i32
    %c0_i32_1 = arith.constant 0 : i32
    return %c0_i32, %c0_i32_0 : i32, i32
  }
  func.func @transform_1(%arg0: i32) -> (i32, i32) {
    %c0_i32 = arith.constant 0 : i32
    %c0_i32_0 = arith.constant 0 : i32
    %c0_i32_1 = arith.constant 0 : i32
    return %c0_i32, %c0_i32_0 : i32, i32
  }
  func.func @transform_2(%arg0: i32) -> (i32, i32) {
    %c0_i32 = arith.constant 0 : i32
    %c0_i32_0 = arith.constant 0 : i32
    %c0_i32_1 = arith.constant 0 : i32
    return %c0_i32, %c0_i32_0 : i32, i32
  }
  func.func @transform_3(%arg0: i32) -> (i32, i32, i32) {
    %c0_i32 = arith.constant 0 : i32
    %c0_i32_0 = arith.constant 0 : i32
    %c0_i32_1 = arith.constant 0 : i32
    %c0_i32_2 = arith.constant 0 : i32
    return %c0_i32, %c0_i32_0, %c0_i32_1 : i32, i32, i32
  }
  func.func @transform_4(%arg0: i32) -> (i32, i32, i32) {
    %c0_i32 = arith.constant 0 : i32
    %c0_i32_0 = arith.constant 0 : i32
    %c0_i32_1 = arith.constant 0 : i32
    %c0_i32_2 = arith.constant 0 : i32
    return %c0_i32, %c0_i32_0, %c0_i32_1 : i32, i32, i32
  }
  func.func @transform_5(%arg0: i32) -> (i32, i32, i32) {
    %c0_i32 = arith.constant 0 : i32
    %c0_i32_0 = arith.constant 0 : i32
    %c0_i32_1 = arith.constant 0 : i32
    %c0_i32_2 = arith.constant 0 : i32
    return %c0_i32, %c0_i32_0, %c0_i32_1 : i32, i32, i32
  }
  func.func @transform_6(%arg0: i32) -> (i32, i32, i32) {
    %c0_i32 = arith.constant 0 : i32
    %c0_i32_0 = arith.constant 0 : i32
    %c0_i32_1 = arith.constant 0 : i32
    %c0_i32_2 = arith.constant 0 : i32
    return %c0_i32, %c0_i32_0, %c0_i32_1 : i32, i32, i32
  }
  func.func @transform_7(%arg0: i32) -> (i32, i32, i32) {
    %c0_i32 = arith.constant 0 : i32
    %c0_i32_0 = arith.constant 0 : i32
    %c0_i32_1 = arith.constant 0 : i32
    %c0_i32_2 = arith.constant 0 : i32
    return %c0_i32, %c0_i32_0, %c0_i32_1 : i32, i32, i32
  }
  func.func @transform_8(%arg0: i32) -> (i32, i32, i32) {
    %c0_i32 = arith.constant 0 : i32
    %c0_i32_0 = arith.constant 0 : i32
    %c0_i32_1 = arith.constant 0 : i32
    %c0_i32_2 = arith.constant 0 : i32
    return %c0_i32, %c0_i32_0, %c0_i32_1 : i32, i32, i32
  }
  func.func @transform_9(%arg0: i32) -> (i32, i32, i32) {
    %c0_i32 = arith.constant 0 : i32
    %c0_i32_0 = arith.constant 0 : i32
    %c0_i32_1 = arith.constant 0 : i32
    %c0_i32_2 = arith.constant 0 : i32
    return %c0_i32, %c0_i32_0, %c0_i32_1 : i32, i32, i32
  }
  func.func @transform_10(%arg0: i32) -> (i32, i32) {
    %c0_i32 = arith.constant 0 : i32
    %c0_i32_0 = arith.constant 0 : i32
    %c0_i32_1 = arith.constant 0 : i32
    return %c0_i32, %c0_i32_0 : i32, i32
  }
  func.func @transform_11(%arg0: i32) -> (i32, i32) {
    %c0_i32 = arith.constant 0 : i32
    %c0_i32_0 = arith.constant 0 : i32
    %c0_i32_1 = arith.constant 0 : i32
    return %c0_i32, %c0_i32_0 : i32, i32
  }
  func.func @transform_12(%arg0: i32) -> (i32, i32) {
    %c0_i32 = arith.constant 0 : i32
    %c0_i32_0 = arith.constant 0 : i32
    %c0_i32_1 = arith.constant 0 : i32
    return %c0_i32, %c0_i32_0 : i32, i32
  }
  func.func @transform_13(%arg0: i32) -> (i32, i32) {
    %c0_i32 = arith.constant 0 : i32
    %c0_i32_0 = arith.constant 0 : i32
    %c0_i32_1 = arith.constant 0 : i32
    return %c0_i32, %c0_i32_0 : i32, i32
  }
  func.func @transform_14(%arg0: i32) -> (i32, i32) {
    %c0_i32 = arith.constant 0 : i32
    %c0_i32_0 = arith.constant 0 : i32
    %c0_i32_1 = arith.constant 0 : i32
    return %c0_i32, %c0_i32_0 : i32, i32
  }
}

</mosaic_0001>

<bundles_post_ra>
// kernel: tpu_custom_call.1
= control target key start
LH: loop header
LB: loop body
LE: loop exit
PB: predicated region body
PF: predicated region fallthrough
CT: control target
= control target key end

     0   :  { %19 = vsyncpa [#allocation3], 0  ;;  %s2634_s0 = inlined_call_operand.vmem [shape: f32[16,32], index: 0, kind: input, shape index: {}]   ;;  %s2635_s1 = inlined_call_operand.hbm [shape: f32[16,16], index: 1, kind: input, shape index: {}]   ;;  %s2636_s2 = inlined_call_operand.hbm [shape: f32[2,32], index: 2, kind: input, shape index: {}]   ;;  %s2637_s3 = inlined_call_operand.vmem [shape: bf16[2,32,96], index: 3, kind: input, shape index: {}]   ;;  %s2638_s4 = inlined_call_operand.hbm [shape: f32[2,1,96], index: 4, kind: input, shape index: {}]   ;;  %s2639_s5 = inlined_call_operand.vmem [shape: bf16[2,32,32], index: 5, kind: input, shape index: {}]   ;;  %s2640_s6 = inlined_call_operand.vmem [shape: bf16[2,32,64], index: 6, kind: input, shape index: {}]   ;;  %s2641_s7 = inlined_call_operand.hbm [shape: f32[2,1,64], index: 7, kind: input, shape index: {}]   ;;  %s2642_s8 = inlined_call_operand.vmem [shape: bf16[2,64,32], index: 8, kind: input, shape index: {}]   ;;  %s2643_s9 = inlined_call_operand.vmem [shape: f32[2,6,32], index: 9, kind: input, shape index: {}]   ;;  %s2644_s10 = inlined_call_operand.vmem [shape: bf16[32,32], index: 10, kind: input, shape index: {}]   ;;  %s2645_s11 = inlined_call_operand.vmem [shape: f32[1,32], index: 11, kind: input, shape index: {}]   ;;  %s2646_s12 = inlined_call_operand.hbm [shape: bf16[32,128], index: 12, kind: input, shape index: {}]   ;;  %s2647_s13 = inlined_call_operand.vmem [shape: f32[1,128], index: 13, kind: input, shape index: {}]   ;;  %s2648_s14 = inlined_call_operand.hbm [shape: f32[2,128], index: 14, kind: output, shape index: {}]  }
   0x1   :  { %20 = vsyncpa [#allocation6], 0 }
   0x2   :  { %21 = vsyncpa [#allocation9], 0 }
   0x3   :  { %22 = vsyncpa [#allocation4], 0  ;;  %s2116_s29 = smov [#allocation5]   ;;  %s1976_s17 = scalar_lea.hbm %s2636_s2, 32 }
   0x4   :  { %s43_s30 = sshll.u32 %s2116_s29, 4  ;;  %p1977_p0 = scmp.ne.s32.totalorder %s2636_s2, %s1976_s17  ;;  %s44_s30 = int_to_ptr.vmem [resolvable:$true] %s43_s30 }
   0x5   :  { %p1980_p1 = scmp.lt.u32.totalorder %s1976_s17, %s2636_s2 }
   0x7   :  { %p1982_p2 = pnand %p1980_p1, %p1977_p0 }
   0x9   :  { %1985 = shalt.err (!%p1982_p2)
}
   0xa   :  { %s1986_s22 = scalar_lea.vmem %s44_s30, 32  ;;  %p1991_p4 = scmp.lt.s32.totalorder %s44_s30, %s44_s30 }
   0xb   :  { %p1987_p3 = scmp.ne.s32.totalorder %s44_s30, %s1986_s22  ;;  %p1992_p5 = scmp.lt.s32.totalorder %s1986_s22, %s1986_s22 }
   0xd   :  { %p1993_p6 = por %p1992_p5, %p1991_p4 }
   0xf   :  { %p1994_p7 = pnand %p1993_p6, %p1987_p3 }
  0x11   :  { %1997 = shalt.err (!%p1994_p7)
}
  0x12   :  { %46 = dma.hbm_to_vmem [thread:$0]  %s2636_s2, 32, %s44_s30, [#allocation6]  }
  0x13   :  { %s2117_s25 = smov [#allocation8]   ;;  %s2118_s27 = smov [#allocation2]  }
  0x14   :  { %s70_s26 = sshll.u32 %s2117_s25, 4  ;;  %s30_s28 = sshll.u32 %s2118_s27, 4  ;;  %s71_s26 = int_to_ptr.vmem [resolvable:$true] %s70_s26  ;;  %s31_s28 = int_to_ptr.vmem [resolvable:$true] %s30_s28 }
  0x15   :  { %s1998_s16 = scalar_lea.hbm %s2641_s7, 32 }
  0x16   :  { %p1999_p8 = scmp.ne.s32.totalorder %s2641_s7, %s1998_s16  ;;  %p2002_p9 = scmp.lt.u32.totalorder %s1998_s16, %s2641_s7 }
  0x18   :  { %p2004_p10 = pnand %p2002_p9, %p1999_p8 }
  0x1a   :  { %2007 = shalt.err (!%p2004_p10)
}
  0x1b   :  { %s2008_s2 = scalar_lea.vmem %s71_s26, 32  ;;  %p2013_p12 = scmp.lt.s32.totalorder %s71_s26, %s71_s26 }
  0x1c   :  { %p2009_p11 = scmp.ne.s32.totalorder %s71_s26, %s2008_s2  ;;  %p2014_p13 = scmp.lt.s32.totalorder %s2008_s2, %s2008_s2 }
  0x1e   :  { %p2015_p0 = por %p2014_p13, %p2013_p12 }
  0x20   :  { %p2016_p1 = pnand %p2015_p0, %p2009_p11 }
  0x22   :  { %2019 = shalt.err (!%p2016_p1)
}
  0x23   :  { %s2119_s30 = smov 16   ;;  %s2120_s21 = smov 1  }
  0x24   :  { %76 = dma.hbm_to_vmem [thread:$0]  %s2641_s7, 32, %s71_s26, [#allocation9], %s2119_s30, %s2119_s30, %s2120_s21  }
  0x25   :  { %s2020_s27 = scalar_lea.hbm %s2635_s1, 256 }
  0x26   :  { %p2021_p2 = scmp.ne.s32.totalorder %s2635_s1, %s2020_s27  ;;  %p2024_p3 = scmp.lt.u32.totalorder %s2020_s27, %s2635_s1 }
  0x28   :  { %p2026_p4 = pnand %p2024_p3, %p2021_p2 }
  0x2a   :  { %2029 = shalt.err (!%p2026_p4)
}
  0x2b   :  { %s2030_s18 = scalar_lea.vmem %s31_s28, 256  ;;  %p2035_p6 = scmp.lt.s32.totalorder %s31_s28, %s31_s28 }
  0x2c   :  { %p2031_p5 = scmp.ne.s32.totalorder %s31_s28, %s2030_s18  ;;  %p2036_p7 = scmp.lt.s32.totalorder %s2030_s18, %s2030_s18 }
  0x2e   :  { %p2037_p8 = por %p2036_p7, %p2035_p6 }
  0x30   :  { %p2038_p9 = pnand %p2037_p8, %p2031_p5 }
  0x32   :  { %2041 = shalt.err (!%p2038_p9)
}
  0x33   :  { %s2121_s7 = smov 128   ;;  %s2122_s26 = smov 8  }
  0x34   :  { %36 = dma.hbm_to_vmem [thread:$0]  %s2635_s1, 256, %s31_s28, [#allocation3], %s2121_s7, %s2121_s7, %s2122_s26  }
  0x35   :  { %s2123_s2 = smov [#allocation7]   ;;  %s2124_s23 = smov [#allocation10]  }
  0x36   :  { %s54_s22 = sshll.u32 %s2123_s2, 4  ;;  %s90_s24 = sshll.u32 %s2124_s23, 4  ;;  %s55_s22 = int_to_ptr.vmem [resolvable:$true] %s54_s22  ;;  %s91_s24 = int_to_ptr.vmem [resolvable:$true] %s90_s24 }
  0x37   :  { %s2042_s29 = scalar_lea.hbm %s2638_s4, 32 }
  0x38   :  { %p2043_p10 = scmp.ne.s32.totalorder %s2638_s4, %s2042_s29  ;;  %p2046_p11 = scmp.lt.u32.totalorder %s2042_s29, %s2638_s4 }
  0x3a   :  { %p2048_p12 = pnand %p2046_p11, %p2043_p10 }
  0x3c   :  { %2051 = shalt.err (!%p2048_p12)
}
  0x3d   :  { %s2052_s1 = scalar_lea.vmem %s55_s22, 32  ;;  %p2057_p0 = scmp.lt.s32.totalorder %s55_s22, %s55_s22 }
  0x3e   :  { %p2053_p13 = scmp.ne.s32.totalorder %s55_s22, %s2052_s1  ;;  %p2058_p1 = scmp.lt.s32.totalorder %s2052_s1, %s2052_s1 }
  0x40   :  { %p2059_p2 = por %p2058_p1, %p2057_p0 }
  0x42   :  { %p2060_p3 = pnand %p2059_p2, %p2053_p13 }
  0x44   :  { %2063 = shalt.err (!%p2060_p3)
}
  0x45   :  { %60 = dma.hbm_to_vmem [thread:$0]  %s2638_s4, 32, %s55_s22, [#allocation6], %s2119_s30, %s2119_s30, %s2120_s21  }
  0x46   :  { %s2064_s20 = scalar_lea.hbm %s2646_s12, 256 }
  0x47   :  { %p2065_p4 = scmp.ne.s32.totalorder %s2646_s12, %s2064_s20  ;;  %p2068_p5 = scmp.lt.u32.totalorder %s2064_s20, %s2646_s12 }
  0x49   :  { %p2070_p6 = pnand %p2068_p5, %p2065_p4 }
  0x4b   :  { %2073 = shalt.err (!%p2070_p6)
}
  0x4c   :  { %s2074_s29 = scalar_lea.vmem %s91_s24, 256  ;;  %p2079_p8 = scmp.lt.s32.totalorder %s91_s24, %s91_s24 }
  0x4d   :  { %p2075_p7 = scmp.ne.s32.totalorder %s91_s24, %s2074_s29  ;;  %p2080_p9 = scmp.lt.s32.totalorder %s2074_s29, %s2074_s29 }
  0x4f   :  { %p2081_p10 = por %p2080_p9, %p2079_p8 }
  0x51   :  { %p2082_p11 = pnand %p2081_p10, %p2075_p7 }
  0x53   :  { %2085 = shalt.err (!%p2082_p11)
}
  0x54   :  { %s2125_s4 = smov 64   ;;  %s2126_s30 = smov 4  }
  0x55   :  { %96 = dma.hbm_to_vmem [thread:$0]  %s2646_s12, 256, %s91_s24, [#allocation9], %s2125_s4, %s2125_s4, %s2126_s30  }
  0x56   :  { %2108 = dma.done.wait [#allocation3], 256  }
  0x57   :  { %2109 = vsyncadd [#allocation3], 4294967040 }
  0x58   :  { %2110 = dma.done.wait [#allocation6], 64  }
  0x59   :  { %2111 = vsyncadd [#allocation6], 4294967232 }
  0x5a   :  { %2112 = dma.done.wait [#allocation9], 288  }
  0x5b   :  { %2113 = vsyncadd [#allocation9], 4294967008  ;;  %vm133_vm0 = vcmask 261120   ;;  %v129_v0 = vld [vmem:[%s2634_s0] sm:$0xff]  ;;  %v130_v1 = vld [vmem:[%s2634_s0 + $0x8] sm:$0xff]  ;;  %v2127_v15 = vmov 0.0   ;;  %v115_v34 = vlaneseq }
  0x5c   :  { %v134_v2 = vsel %vm133_vm0, %v129_v0, 0.0  ;;  %v137_v3 = vsel %vm133_vm0, %v130_v1, 0.0  ;;  %v1890_v14 = vld [vmem:[%s2637_s3] sm:$0xff]   ;;  %1731 = vmatprep.subr.bf16.mxu0 %v2127_v15  ;;  %1739 = vmatprep.subr.bf16.mxu1 %v2127_v15  ;;  %v1891_v16 = vld [vmem:[%s2637_s3 + $0x8] sm:$0xff]   ;;  %vm2128_vm1 = vmmov 0   ;;  %s2129_s28 = smov 96  }
  0x5d   :  { %135 = vadd.xlane.f32.xlu0 %v134_v2  ;;  %1732 = vmatpush3.bf16.msra.mxu0 %v1890_v14  ;;  %v1610_v25 = vld [vmem:[#allocation5] ss:$0 sm:$0xff]  ;;  %v1611_v29 = vld [vmem:[#allocation5 + $0x1] ss:$0 sm:$0xff]  ;;  %v1612_v35 = vld [vmem:[#allocation7] ss:$0 sm:$0xff] }
  0x5e   :  { %1735 = vmatprep.mubr.msk.bf16.mxu0 %vm2128_vm1, %v2127_v15  ;;  %1733 = vmatprep.subr.bf16.mxu0 %v2127_v15  ;;  %v116_v42 = vand.u32 127, %v115_v34  ;;  %v2340_v54 = vld [vmem:[#allocation2] sm:$0xff]  ;;  %v2342_v57 = vld [vmem:[#allocation2 + $0x8] sm:$0xff]  ;;  %vm296_vm6 = vcmask 130048   ;;  %vm728_vm7 = vcmask 523264   ;;  %vm1453_vm8 = vcmask 1040384  }
  0x5f   :  { %1741 = vmatprep.mubr.msk.bf16.mxu1 %vm2128_vm1, %v2127_v15  ;;  %s2130_s7 = smov [#allocation11]  }
  0x60   :  { %vm118_vm2 = vcmp.lt.s32.totalorder %v116_v42, 16  ;;  %vm122_vm3 = vcmp.ge.s32.totalorder %v116_v42, 16  ;;  %vm123_vm4 = vcmp.lt.s32.totalorder %v116_v42, 32  ;;  %v1892_v42 = vld [vmem:[%s2639_s5] sm:$0xff]   ;;  %s1597_s26 = sshll.u32 %s2130_s7, 4  ;;  %s1598_s26 = int_to_ptr.vmem [resolvable:$true] %s1597_s26 }
  0x61   :  { %138 = vadd.xlane.f32.xlu0 %v137_v3  ;;  %1734 = vmatpush3.bf16.msra.mxu0 %v1891_v16  ;;  %v2316_v44 = vsel %vm118_vm2, 1.0, %v2127_v15  ;;  %vm124_vm5 = vmand %vm122_vm3, %vm123_vm4  ;;  %p2091_p13 = scmp.lt.s32.totalorder %s1598_s26, %s1598_s26 }
  0x62   :  { %1745 = vmatprep.subr.bf16.mxu0 %v2127_v15  ;;  %v2322_v47 = vsel %vm124_vm5, 1.0, %v2127_v15 }
  0xea   :  { %v136_v4 = vpop.xlane.xlu0 %135 }
  0xeb   :  { %v141_v5 = vmul.f32 0.03125, %v136_v4 }
  0xed   :  { %v143_v6 = vsub.f32 %v129_v0, %v141_v5 }
  0xee   :  { %v139_v7 = vpop.xlane.xlu0 %138 }
  0xef   :  { %v142_v8 = vmul.f32 0.03125, %v139_v7  ;;  %v145_v9 = vmul.f32 %v143_v6, %v143_v6 }
  0xf1   :  { %v144_v10 = vsub.f32 %v130_v1, %v142_v8  ;;  %v147_v11 = vsel %vm133_vm0, %v145_v9, 0.0 }
  0xf2   :  { %148 = vadd.xlane.f32.xlu1 %v147_v11 }
  0xf3   :  { %v146_v12 = vmul.f32 %v144_v10, %v144_v10 }
  0xf5   :  { %v150_v13 = vsel %vm133_vm0, %v146_v12, 0.0 }
  0xf6   :  { %151 = vadd.xlane.f32.xlu1 %v150_v13 }
 0x17f   :  { %v149_v17 = vpop.xlane.xlu1 %148 }
 0x180   :  { %v153_v18 = vmul.f32 0.03125, %v149_v17 }
 0x182   :  { %v155_v19 = vadd.f32 1e-12, %v153_v18 }
 0x183   :  { %v152_v20 = vpop.xlane.xlu1 %151 }
 0x184   :  { %1914 = vrsqrt.f32 %v155_v19  ;;  %v154_v21 = vmul.f32 0.03125, %v152_v20 }
 0x186   :  { %v156_v22 = vadd.f32 1e-12, %v154_v21 }
 0x188   :  { %1916 = vrsqrt.f32 %v156_v22 }
 0x18e   :  { %v1915_v23 = vpop.eup %1914 }
 0x18f   :  { %v159_v24 = vmul.f32 %v1915_v23, %v143_v6 }
 0x191   :  { %v165_v28 = vmul.f32 %v1610_v25, %v159_v24 }
 0x192   :  { %v1917_v26 = vpop.eup %1916 }
 0x193   :  { %v160_v27 = vmul.f32 %v1917_v26, %v144_v10  ;;  %v2298_v31 = vadd.f32 %v1611_v29, %v165_v28 }
 0x195   :  { %v166_v30 = vmul.f32 %v1610_v25, %v160_v27 }
 0x197   :  { %v2300_v32 = vadd.f32 %v1611_v29, %v166_v30 }
 0x199   :  { %v174_v33 = vpack.c.bf16 %v2300_v32, %v2298_v31 }
 0x19b   :  { %1736 = vmatmul.mubr.msk.bf16.vlgmr.msra.gmra.mrb[0].mxu0 %vm133_vm0, %v174_v33 }
 0x19c   :  { %1747 = vmatprep.mubr.msk.bf16.mxu0 %vm2128_vm1, %v2127_v15 }
 0x26e   :  { %v235_v36 = vpop.f32.mrb[0].mxu0 }
 0x26f   :  { %v1737_v37 = vpop.f32.mrb[1].mxu0  ;;  %v2307_v39 = vadd.f32 %v1612_v35, %v235_v36 }
 0x270   :  { %v238_v38 = vpop.f32.mrb[2].mxu0 }
 0x271   :  { %v2309_v40 = vadd.f32 %v1612_v35, %v238_v38  ;;  %v1738_v41 = vpop.f32.mrb[3].mxu0  ;;  %v242_v50 = vmul.f32 %v2316_v44, %v2307_v39  ;;  %v327_v51 = vmul.f32 %v2322_v47, %v2307_v39 }
 0x273   :  { %v245_v43 = vpack.c.bf16 %v2309_v40, %v2307_v39  ;;  %v243_v48 = vmul.f32 %v2316_v44, %v2309_v40  ;;  %v328_v49 = vmul.f32 %v2322_v47, %v2309_v40 }
 0x275   :  { %247 = vrot.lane.b32.xlu0 %v245_v43, %s2129_s28  ;;  %v244_v52 = vpack.c.bf16 %v243_v48, %v242_v50  ;;  %v329_v53 = vpack.c.bf16 %v328_v49, %v327_v51 }
 0x279   :  { %321 = vrot.lane.b32.xlu0 %v2316_v44, %s2125_s4 }
 0x2e7   :  { %v248_v45 = vpop.permute.xlu0 %247 }
 0x2e8   :  { %v253_v46 = vsel %vm133_vm0, %v248_v45, 0 }
 0x2e9   :  { %1740 = vmatpush3.bf16.xpose.msra.mxu1 %v253_v46  ;;  %1746 = vmatpush3.bf16.xpose.msra.mxu0 %v253_v46 }
 0x2ea   :  { %1751 = vmatprep.subr.bf16.mxu1 %v2127_v15  ;;  %1763 = vmatprep.subr.bf16.mxu0 %v2127_v15 }
 0x2eb   :  { %v2358_v29 = vpop.permute.xlu0 %321 }
 0x2ec   :  { %v324_v30 = vmul.f32 %v2358_v29, %v2307_v39  ;;  %v325_v33 = vmul.f32 %v2358_v29, %v2309_v40 }
 0x2ee   :  { %v326_v35 = vpack.c.bf16 %v325_v33, %v324_v30 }
 0x2f0   :  { %1742 = vmatmul.mubr.msk.bf16.vlgmr.msra.gmra.mrb[0].mxu1 %vm133_vm0, %v244_v52  ;;  %1748 = vmatmul.mubr.msk.bf16.vlgmr.msra.gmra.mrb[4].mxu0 %vm133_vm0, %v329_v53 }
 0x2f1   :  { %1753 = vmatprep.mubr.msk.bf16.mxu1 %vm2128_vm1, %v2127_v15  ;;  %1767 = vmatprep.mubr.msk.bf16.mxu0 %vm2128_vm1, %v2127_v15 }
 0x2f2   :  { %1764 = vmatpush3.bf16.msra.mxu0 %v1892_v42 }
 0x2f3   :  { %1765 = vmatprep.subr.bf16.mxu0 %v2127_v15 }
 0x3c3   :  { %v289_v55 = vpop.f32.mrb[0].mxu1  ;;  %v367_v56 = vpop.f32.mrb[4].mxu0 }
 0x3c4   :  { %v368_v58 = vadd.f32 %v367_v56, %v2340_v54  ;;  %v1743_v59 = vpop.f32.mrb[1].mxu1  ;;  %v1749_v60 = vpop.f32.mrb[5].mxu0  ;;  %v290_v3 = vadd.f32 %v289_v55, %v2340_v54 }
 0x3c5   :  { %v292_v61 = vpop.f32.mrb[2].mxu1  ;;  %v370_v62 = vpop.f32.mrb[6].mxu0 }
 0x3c6   :  { %v371_v63 = vadd.f32 %v370_v62, %v2342_v57  ;;  %v1744_v0 = vpop.f32.mrb[3].mxu1  ;;  %v1750_v1 = vpop.f32.mrb[7].mxu0  ;;  %v374_v2 = vsel %vm296_vm6, %v368_v58, -inf  ;;  %v293_v5 = vadd.f32 %v292_v61, %v2342_v57  ;;  %v297_v6 = vsel %vm296_vm6, %v290_v3, -inf  ;;  %v1893_v61 = vld [vmem:[%s2639_s5 + $0x8] sm:$0xff]  }
 0x3c7   :  { %375 = vmax.xlane.f32.xlu1 %v374_v2  ;;  %1766 = vmatpush3.bf16.msra.mxu0 %v1893_v61 }
 0x3c8   :  { %v377_v4 = vsel %vm296_vm6, %v371_v63, -inf  ;;  %v300_v7 = vsel %vm296_vm6, %v293_v5, -inf  ;;  %1771 = vmatprep.subr.bf16.mxu0 %v2127_v15 }
 0x3cb   :  { %378 = vmax.xlane.f32.xlu1 %v377_v4 }
 0x3cf   :  { %298 = vmax.xlane.f32.xlu1 %v297_v6 }
 0x3d3   :  { %301 = vmax.xlane.f32.xlu1 %v300_v7 }
 0x3e4   :  { %398 = vrot.lane.b32.xlu1 %v2322_v47, %s2125_s4 }
 0x454   :  { %v376_v8 = vpop.xlane.xlu1 %375 }
 0x455   :  { %v380_v9 = vsub.f32 %v368_v58, %v376_v8 }
 0x457   :  { %v382_v10 = vmul.f32 1.442695, %v380_v9 }
 0x458   :  { %v379_v11 = vpop.xlane.xlu1 %378 }
 0x459   :  { %1918 = vpow2.f32 %v382_v10  ;;  %v381_v12 = vsub.f32 %v371_v63, %v379_v11 }
 0x45b   :  { %v384_v13 = vmul.f32 1.442695, %v381_v12 }
 0x45c   :  { %v299_v14 = vpop.xlane.xlu1 %298 }
 0x45d   :  { %1920 = vpow2.f32 %v384_v13  ;;  %v303_v16 = vsub.f32 %v290_v3, %v299_v14  ;;  %v2392_v3 = vshrl.u32 %v115_v34, 7 }
 0x45f   :  { %v305_v17 = vmul.f32 1.442695, %v303_v16  ;;  %v507_v4 = vsub.s32 0, %v2392_v3 }
 0x460   :  { %v302_v18 = vpop.xlane.xlu1 %301 }
 0x461   :  { %1922 = vpow2.f32 %v305_v17  ;;  %v304_v19 = vsub.f32 %v293_v5, %v302_v18  ;;  %v2398_v5 = vld [vmem:[%s2643_s9] sm:$0x3f] }
 0x462   :  { %v508_v6 = vrot.slane %v2398_v5, %v507_v4 }
 0x463   :  { %v1919_v20 = vpop.eup %1918  ;;  %v307_v21 = vmul.f32 1.442695, %v304_v19 }
 0x464   :  { %v386_v22 = vsel %vm296_vm6, %v1919_v20, 0.0  ;;  %v2365_v36 = vpop.permute.xlu1 %398 }
 0x465   :  { %1924 = vpow2.f32 %v307_v21  ;;  %387 = vadd.xlane.f32.xlu0 %v386_v22  ;;  %v401_v37 = vmul.f32 %v2365_v36, %v2307_v39  ;;  %v402_v38 = vmul.f32 %v2365_v36, %v2309_v40 }
 0x467   :  { %v1921_v23 = vpop.eup %1920  ;;  %v403_v41 = vpack.c.bf16 %v402_v38, %v401_v37  ;;  %v595_v38 = vsub.s32 1, %v2392_v3 }
 0x468   :  { %v389_v24 = vsel %vm296_vm6, %v1921_v23, 0.0 }
 0x469   :  { %390 = vadd.xlane.f32.xlu1 %v389_v24  ;;  %v596_v42 = vrot.slane %v2398_v5, %v595_v38 }
 0x46b   :  { %v1923_v25 = vpop.eup %1922 }
 0x46c   :  { %v309_v26 = vsel %vm296_vm6, %v1923_v25, 0.0 }
 0x46d   :  { %310 = vadd.xlane.f32.xlu0 %v309_v26  ;;  %v1895_v26 = vld [vmem:[%s2640_s6 + $0x8] sm:$0xff]  }
 0x46f   :  { %v1925_v27 = vpop.eup %1924 }
 0x470   :  { %v312_v28 = vsel %vm296_vm6, %v1925_v27, 0.0 }
 0x471   :  { %313 = vadd.xlane.f32.xlu0 %v312_v28 }
 0x47a   :  { %453 = vrot.lane.b32.xlu1 %v326_v35, %s2125_s4 }
 0x487   :  { %405 = vrot.lane.b32.xlu0 %v403_v41, %s2125_s4 }
 0x4f2   :  { %v388_v43 = vpop.xlane.xlu0 %387 }
 0x4f3   :  { %1926 = vrcp.f32 %v388_v43 }
 0x4f6   :  { %v391_v45 = vpop.xlane.xlu1 %390 }
 0x4f7   :  { %1928 = vrcp.f32 %v391_v45  ;;  %v601_v45 = vsub.s32 2, %v2392_v3 }
 0x4fa   :  { %v311_v46 = vpop.xlane.xlu0 %310  ;;  %v454_v53 = vpop.permute.xlu1 %453 }
 0x4fd   :  { %v1927_v39 = vpop.eup %1926 }
 0x4fe   :  { %v314_v48 = vpop.xlane.xlu0 %313  ;;  %v394_v40 = vmul.f32 %v1927_v39, %v1919_v20 }
 0x4ff   :  { %1930 = vrcp.f32 %v314_v48 }
 0x500   :  { %1932 = vrcp.f32 %v311_v46 }
 0x501   :  { %v1929_v49 = vpop.eup %1928 }
 0x502   :  { %v395_v50 = vmul.f32 %v1929_v49, %v1921_v23  ;;  %v406_v51 = vpop.permute.xlu0 %405  ;;  %v602_v49 = vrot.slane %v2398_v5, %v601_v45 }
 0x503   :  { %1752 = vmatpush3.bf16.msra.mxu1 %v406_v51 }
 0x504   :  { %v396_v52 = vpack.c.bf16 %v395_v50, %v394_v40  ;;  %1757 = vmatprep.subr.bf16.mxu1 %v2127_v15 }
 0x506   :  { %1754 = vmatmul.mubr.msk.bf16.vlgmr.msra.gmra.mrb[4].mxu1 %vm296_vm6, %v396_v52 }
 0x507   :  { %1758 = vmatpush3.bf16.msra.mxu1 %v454_v53  ;;  %1759 = vmatprep.mubr.msk.bf16.mxu1 %vm2128_vm1, %v2127_v15  ;;  %v1896_v53 = vld [vmem:[%s2642_s8] sm:$0xff]  }
 0x508   :  { %1779 = vmatprep.subr.bf16.mxu1 %v2127_v15 }
 0x509   :  { %v1931_v55 = vpop.eup %1930 }
 0x50a   :  { %v1933_v56 = vpop.eup %1932  ;;  %v318_v58 = vmul.f32 %v1931_v55, %v1925_v27  ;;  %v1897_v55 = vld [vmem:[%s2642_s8 + $0x8] sm:$0xff]  }
 0x50b   :  { %v317_v59 = vmul.f32 %v1933_v56, %v1923_v25  ;;  %v1898_v56 = vld [vmem:[%s2642_s8 + $0x10] sm:$0xff]  }
 0x50d   :  { %v319_v60 = vpack.c.bf16 %v318_v58, %v317_v59  ;;  %v1899_v58 = vld [vmem:[%s2642_s8 + $0x18] sm:$0xff]   ;;  %v1623_v59 = vld [vmem:[#allocation8] ss:$0 sm:$0xff] }
 0x512   :  { %1760 = vmatmul.mubr.msk.bf16.vlgmr.msra.gmra.mrb[4].mxu1 %vm296_vm6, %v319_v60 }
 0x513   :  { %1787 = vmatprep.mubr.msk.bf16.mxu1 %vm2128_vm1, %v2127_v15  ;;  %1780 = vmatpush3.bf16.msra.mxu1 %v1896_v53 }
 0x514   :  { %1781 = vmatprep.subr.bf16.mxu1 %v2127_v15 }
 0x517   :  { %1782 = vmatpush3.bf16.msra.mxu1 %v1897_v55  ;;  %v1901_v55 = vld [vmem:[%s2637_s3 + $0x18] sm:$0xff]  }
 0x518   :  { %1783 = vmatprep.subr.bf16.mxu1 %v2127_v15 }
 0x51b   :  { %1784 = vmatpush3.bf16.msra.mxu1 %v1898_v56 }
 0x51c   :  { %1785 = vmatprep.subr.bf16.mxu1 %v2127_v15 }
 0x51f   :  { %1786 = vmatpush3.bf16.msra.mxu1 %v1899_v58 }
 0x520   :  { %1805 = vmatprep.subr.bf16.mxu1 %v2127_v15 }
 0x5e5   :  { %v493_v62 = vpop.f32.mrb[4].mxu1 }
 0x5e6   :  { %v1761_v63 = vpop.f32.mrb[5].mxu1 }
 0x5e7   :  { %v496_v0 = vpop.f32.mrb[6].mxu1 }
 0x5e8   :  { %v500_v1 = vpack.c.bf16 %v496_v0, %v493_v62  ;;  %v1762_v2 = vpop.f32.mrb[7].mxu1 }
 0x5ea   :  { %1768 = vmatmul.mubr.msk.bf16.vlgmr.msra.gmra.mrb[8].mxu0 %vm133_vm0, %v500_v1 }
 0x5eb   :  { %1775 = vmatprep.mubr.msk.bf16.mxu0 %vm2128_vm1, %v2127_v15 }
 0x6bd   :  { %v558_v7 = vpop.f32.mrb[8].mxu0 }
 0x6be   :  { %v559_v8 = vadd.f32 %v558_v7, %v508_v6  ;;  %v1769_v9 = vpop.f32.mrb[9].mxu0 }
 0x6bf   :  { %v561_v10 = vpop.f32.mrb[10].mxu0 }
 0x6c0   :  { %v562_v11 = vadd.f32 %v561_v10, %v508_v6  ;;  %v1770_v12 = vpop.f32.mrb[11].mxu0  ;;  %v565_v34 = vadd.f32 %v559_v8, %v2298_v31 }
 0x6c2   :  { %v567_v13 = vsel %vm133_vm0, %v565_v34, 0.0  ;;  %v566_v14 = vadd.f32 %v562_v11, %v2300_v32  ;;  %v1894_v32 = vld [vmem:[%s2640_s6] sm:$0xff]  }
 0x6c3   :  { %568 = vadd.xlane.f32.xlu1 %v567_v13  ;;  %1772 = vmatpush3.bf16.msra.mxu0 %v1894_v32 }
 0x6c4   :  { %v570_v16 = vsel %vm133_vm0, %v566_v14, 0.0  ;;  %1773 = vmatprep.subr.bf16.mxu0 %v2127_v15 }
 0x6c5   :  { %571 = vadd.xlane.f32.xlu0 %v570_v16 }
 0x6c7   :  { %1774 = vmatpush3.bf16.msra.mxu0 %v1895_v26 }
 0x6c8   :  { %1791 = vmatprep.subr.bf16.mxu0 %v2127_v15 }
 0x750   :  { %v569_v17 = vpop.xlane.xlu1 %568 }
 0x751   :  { %v573_v18 = vmul.f32 0.03125, %v569_v17 }
 0x752   :  { %v572_v19 = vpop.xlane.xlu0 %571 }
 0x753   :  { %v575_v20 = vsub.f32 %v565_v34, %v573_v18  ;;  %v574_v21 = vmul.f32 0.03125, %v572_v19 }
 0x755   :  { %v576_v22 = vsub.f32 %v566_v14, %v574_v21  ;;  %v577_v23 = vmul.f32 %v575_v20, %v575_v20 }
 0x757   :  { %v579_v24 = vsel %vm133_vm0, %v577_v23, 0.0  ;;  %v578_v25 = vmul.f32 %v576_v22, %v576_v22 }
 0x758   :  { %580 = vadd.xlane.f32.xlu0 %v579_v24  ;;  %v702_v24 = vsub.s32 3, %v2392_v3 }
 0x759   :  { %v582_v31 = vsel %vm133_vm0, %v578_v25, 0.0 }
 0x75a   :  { %v703_v25 = vrot.slane %v2398_v5, %v702_v24 }
 0x75c   :  { %583 = vadd.xlane.f32.xlu0 %v582_v31 }
 0x7e5   :  { %v581_v27 = vpop.xlane.xlu0 %580 }
 0x7e6   :  { %v585_v28 = vmul.f32 0.03125, %v581_v27 }
 0x7e8   :  { %v587_v30 = vadd.f32 1e-12, %v585_v28 }
 0x7e9   :  { %v584_v33 = vpop.xlane.xlu0 %583 }
 0x7ea   :  { %1934 = vrsqrt.f32 %v587_v30  ;;  %v586_v35 = vmul.f32 0.03125, %v584_v33 }
 0x7ec   :  { %v588_v37 = vadd.f32 1e-12, %v586_v35 }
 0x7ee   :  { %1936 = vrsqrt.f32 %v588_v37 }
 0x7f4   :  { %v1935_v41 = vpop.eup %1934 }
 0x7f5   :  { %v591_v43 = vmul.f32 %v1935_v41, %v575_v20 }
 0x7f7   :  { %v597_v48 = vmul.f32 %v596_v42, %v591_v43 }
 0x7f8   :  { %v1937_v46 = vpop.eup %1936 }
 0x7f9   :  { %v592_v39 = vmul.f32 %v1937_v46, %v576_v22  ;;  %v603_v50 = vadd.f32 %v602_v49, %v597_v48 }
 0x7fb   :  { %v598_v40 = vmul.f32 %v596_v42, %v592_v39 }
 0x7fd   :  { %v604_v51 = vadd.f32 %v602_v49, %v598_v40 }
 0x7ff   :  { %v605_v52 = vpack.c.bf16 %v604_v51, %v603_v50 }
 0x801   :  { %1776 = vmatmul.mubr.msk.bf16.vlgmr.msra.gmra.mrb[12].mxu0 %vm133_vm0, %v605_v52 }
 0x802   :  { %1795 = vmatprep.mubr.msk.bf16.mxu0 %vm2128_vm1, %v2127_v15 }
 0x8d4   :  { %v666_v60 = vpop.f32.mrb[12].mxu0 }
 0x8d5   :  { %v667_v61 = vadd.f32 %v1623_v59, %v666_v60  ;;  %v1777_v62 = vpop.f32.mrb[13].mxu0 }
 0x8d6   :  { %v669_v63 = vpop.f32.mrb[14].mxu0 }
 0x8d7   :  { %v675_v0 = vmul.f32 0.044715, %v667_v61  ;;  %v670_v1 = vadd.f32 %v1623_v59, %v669_v63  ;;  %v1778_v2 = vpop.f32.mrb[15].mxu0  ;;  %v673_v18 = vmul.f32 0.5, %v667_v61  ;;  %v803_v63 = vsub.s32 4, %v2392_v3 }
 0x8d9   :  { %v677_v6 = vmul.f32 %v675_v0, %v667_v61  ;;  %v676_v7 = vmul.f32 0.044715, %v670_v1  ;;  %v674_v19 = vmul.f32 0.5, %v670_v1  ;;  %v804_v0 = vrot.slane %v2398_v5, %v803_v63 }
 0x8db   :  { %v679_v8 = vmul.f32 %v677_v6, %v667_v61  ;;  %v678_v9 = vmul.f32 %v676_v7, %v670_v1 }
 0x8dd   :  { %v681_v10 = vadd.f32 %v679_v8, %v667_v61  ;;  %v680_v11 = vmul.f32 %v678_v9, %v670_v1 }
 0x8df   :  { %v683_v12 = vmul.f32 0.7978846, %v681_v10  ;;  %v682_v34 = vadd.f32 %v680_v11, %v670_v1  ;;  %v809_v1 = vsub.s32 5, %v2392_v3  ;;  %v1913_v3 = vld [vmem:[#allocation10 + $0x8] sm:$0xff]  }
 0x8e1   :  { %1938 = vtanh.f32 %v683_v12  ;;  %v684_v13 = vmul.f32 0.7978846, %v682_v34  ;;  %v810_v10 = vrot.slane %v2398_v5, %v809_v1 }
 0x8e3   :  { %1940 = vtanh.f32 %v684_v13 }
 0x8eb   :  { %v1939_v14 = vpop.eup %1938 }
 0x8ec   :  { %v687_v16 = vadd.f32 1.0, %v1939_v14  ;;  %v1637_v14 = vld [vmem:[#allocation7 + $0x1] ss:$0 sm:$0xff] }
 0x8ed   :  { %v1941_v17 = vpop.eup %1940 }
 0x8ee   :  { %v688_v20 = vadd.f32 1.0, %v1941_v17  ;;  %v689_v21 = vmul.f32 %v687_v16, %v673_v18 }
 0x8f0   :  { %v690_v22 = vmul.f32 %v688_v20, %v674_v19 }
 0x8f2   :  { %v691_v23 = vpack.c.bf16 %v690_v22, %v689_v21 }
 0x8f4   :  { %1788 = vmatmul.mubr.msk.bf16.vlgmr.msra.gmra.mrb[8].mxu1 %vm728_vm7, %v691_v23 }
 0x8f5   :  { %1807 = vmatprep.mubr.msk.bf16.mxu1 %vm2128_vm1, %v2127_v15 }
 0x9c7   :  { %v766_v31 = vpop.f32.mrb[8].mxu1 }
 0x9c8   :  { %v767_v32 = vadd.f32 %v766_v31, %v703_v25  ;;  %v1789_v26 = vpop.f32.mrb[9].mxu1 }
 0x9c9   :  { %v769_v27 = vpop.f32.mrb[10].mxu1 }
 0x9ca   :  { %v770_v28 = vadd.f32 %v769_v27, %v703_v25  ;;  %v1790_v30 = vpop.f32.mrb[11].mxu1  ;;  %v773_v33 = vadd.f32 %v767_v32, %v603_v50 }
 0x9cc   :  { %v775_v35 = vsel %vm133_vm0, %v773_v33, 0.0  ;;  %v774_v37 = vadd.f32 %v770_v28, %v604_v51  ;;  %v1900_v51 = vld [vmem:[%s2637_s3 + $0x10] sm:$0xff]  }
 0x9cd   :  { %776 = vadd.xlane.f32.xlu1 %v775_v35  ;;  %1792 = vmatpush3.bf16.msra.mxu0 %v1900_v51 }
 0x9ce   :  { %v778_v41 = vsel %vm133_vm0, %v774_v37, 0.0  ;;  %1793 = vmatprep.subr.bf16.mxu0 %v2127_v15 }
 0x9cf   :  { %779 = vadd.xlane.f32.xlu0 %v778_v41 }
 0x9d1   :  { %1794 = vmatpush3.bf16.msra.mxu0 %v1901_v55 }
 0x9d2   :  { %1799 = vmatprep.subr.bf16.mxu0 %v2127_v15 }
 0xa5a   :  { %v777_v42 = vpop.xlane.xlu1 %776 }
 0xa5b   :  { %v781_v43 = vmul.f32 0.03125, %v777_v42 }
 0xa5c   :  { %v780_v46 = vpop.xlane.xlu0 %779 }
 0xa5d   :  { %v783_v48 = vsub.f32 %v773_v33, %v781_v43  ;;  %v782_v39 = vmul.f32 0.03125, %v780_v46 }
 0xa5f   :  { %v784_v49 = vsub.f32 %v774_v37, %v782_v39  ;;  %v785_v40 = vmul.f32 %v783_v48, %v783_v48 }
 0xa61   :  { %v787_v52 = vsel %vm133_vm0, %v785_v40, 0.0  ;;  %v786_v53 = vmul.f32 %v784_v49, %v784_v49 }
 0xa62   :  { %788 = vadd.xlane.f32.xlu1 %v787_v52 }
 0xa63   :  { %v790_v50 = vsel %vm133_vm0, %v786_v53, 0.0 }
 0xa64   :  { %791 = vadd.xlane.f32.xlu0 %v790_v50 }
 0xaef   :  { %v789_v56 = vpop.xlane.xlu1 %788 }
 0xaf0   :  { %v793_v58 = vmul.f32 0.03125, %v789_v56 }
 0xaf1   :  { %v792_v59 = vpop.xlane.xlu0 %791 }
 0xaf2   :  { %v795_v60 = vadd.f32 1e-12, %v793_v58  ;;  %v794_v61 = vmul.f32 0.03125, %v792_v59 }
 0xaf4   :  { %1942 = vrsqrt.f32 %v795_v60  ;;  %v796_v62 = vadd.f32 1e-12, %v794_v61 }
 0xaf6   :  { %1944 = vrsqrt.f32 %v796_v62 }
 0xafe   :  { %v1943_v2 = vpop.eup %1942 }
 0xaff   :  { %v799_v6 = vmul.f32 %v1943_v2, %v783_v48 }
 0xb00   :  { %v1945_v7 = vpop.eup %1944 }
 0xb01   :  { %v805_v8 = vmul.f32 %v804_v0, %v799_v6  ;;  %v800_v9 = vmul.f32 %v1945_v7, %v784_v49 }
 0xb03   :  { %v806_v11 = vmul.f32 %v804_v0, %v800_v9  ;;  %v2471_v12 = vadd.f32 %v810_v10, %v805_v8 }
 0xb05   :  { %v2473_v34 = vadd.f32 %v810_v10, %v806_v11 }
 0xb07   :  { %v815_v13 = vpack.c.bf16 %v2473_v34, %v2471_v12 }
 0xb09   :  { %1796 = vmatmul.mubr.msk.bf16.vlgmr.msra.gmra.mrb[16].mxu0 %vm133_vm0, %v815_v13 }
 0xb0a   :  { %1801 = vmatprep.mubr.msk.bf16.mxu0 %vm2128_vm1, %v2127_v15 }
 0xbdc   :  { %v878_v16 = vpop.f32.mrb[16].mxu0 }
 0xbdd   :  { %v879_v17 = vadd.f32 %v1637_v14, %v878_v16  ;;  %v1797_v18 = vpop.f32.mrb[17].mxu0 }
 0xbde   :  { %v881_v19 = vpop.f32.mrb[18].mxu0 }
 0xbdf   :  { %v882_v20 = vadd.f32 %v1637_v14, %v881_v19  ;;  %v1798_v5 = vpop.f32.mrb[19].mxu0  ;;  %v885_v21 = vmul.f32 %v2316_v44, %v879_v17  ;;  %v965_v22 = vmul.f32 %v2322_v47, %v879_v17  ;;  %v2483_v23 = vmul.f32 %v879_v17, %v2358_v29  ;;  %v1902_v19 = vld [vmem:[%s2639_s5 + $0x10] sm:$0xff]  }
 0xbe0   :  { %v2491_v27 = vmul.f32 %v879_v17, %v2365_v36 }
 0xbe1   :  { %v886_v25 = vmul.f32 %v2316_v44, %v882_v20  ;;  %v966_v31 = vmul.f32 %v2322_v47, %v882_v20  ;;  %v888_v32 = vpack.c.bf16 %v882_v20, %v879_v17  ;;  %v2488_v26 = vmul.f32 %v882_v20, %v2358_v29 }
 0xbe2   :  { %v2494_v28 = vmul.f32 %v882_v20, %v2365_v36 }
 0xbe3   :  { %890 = vrot.lane.b32.xlu1 %v888_v32, %s2129_s28  ;;  %v887_v30 = vpack.c.bf16 %v886_v25, %v885_v21  ;;  %v967_v33 = vpack.c.bf16 %v966_v31, %v965_v22  ;;  %v964_v35 = vpack.c.bf16 %v2488_v26, %v2483_v23 }
 0xbe4   :  { %v1037_v44 = vpack.c.bf16 %v2494_v28, %v2491_v27 }
 0xc55   :  { %v891_v47 = vpop.permute.xlu1 %890 }
 0xc56   :  { %v896_v29 = vsel %vm133_vm0, %v891_v47, 0 }
 0xc57   :  { %1800 = vmatpush3.bf16.xpose.msra.mxu0 %v896_v29  ;;  %1806 = vmatpush3.bf16.xpose.msra.mxu1 %v896_v29  ;;  %v1903_v29 = vld [vmem:[%s2639_s5 + $0x18] sm:$0xff]  }
 0xc58   :  { %1811 = vmatprep.subr.bf16.mxu0 %v2127_v15  ;;  %1823 = vmatprep.subr.bf16.mxu1 %v2127_v15 }
 0xc5e   :  { %1802 = vmatmul.mubr.msk.bf16.vlgmr.msra.gmra.mrb[20].mxu0 %vm133_vm0, %v887_v30  ;;  %1808 = vmatmul.mubr.msk.bf16.vlgmr.msra.gmra.mrb[12].mxu1 %vm133_vm0, %v967_v33 }
 0xc5f   :  { %1813 = vmatprep.mubr.msk.bf16.mxu0 %vm2128_vm1, %v2127_v15  ;;  %1827 = vmatprep.mubr.msk.bf16.mxu1 %vm2128_vm1, %v2127_v15 }
 0xc60   :  { %1824 = vmatpush3.bf16.msra.mxu1 %v1902_v19 }
 0xc61   :  { %1825 = vmatprep.subr.bf16.mxu1 %v2127_v15 }
 0xc64   :  { %1826 = vmatpush3.bf16.msra.mxu1 %v1903_v29 }
 0xc65   :  { %1831 = vmatprep.subr.bf16.mxu1 %v2127_v15 }
 0xd31   :  { %v932_v36 = vpop.f32.mrb[20].mxu0  ;;  %v1005_v37 = vpop.f32.mrb[12].mxu1 }
 0xd32   :  { %v1006_v41 = vadd.f32 %v1005_v37, %v2340_v54  ;;  %v1803_v42 = vpop.f32.mrb[21].mxu0  ;;  %v1809_v43 = vpop.f32.mrb[13].mxu1  ;;  %v933_v53 = vadd.f32 %v932_v36, %v2340_v54 }
 0xd33   :  { %v935_v46 = vpop.f32.mrb[22].mxu0  ;;  %v1008_v48 = vpop.f32.mrb[14].mxu1 }
 0xd34   :  { %v1009_v39 = vadd.f32 %v1008_v48, %v2342_v57  ;;  %v1804_v49 = vpop.f32.mrb[23].mxu0  ;;  %v1810_v40 = vpop.f32.mrb[15].mxu1  ;;  %v1012_v52 = vsel %vm296_vm6, %v1006_v41, -inf  ;;  %v936_v51 = vadd.f32 %v935_v46, %v2342_v57  ;;  %v939_v55 = vsel %vm296_vm6, %v933_v53, -inf  ;;  %v2546_v46 = vld [vmem:[%s2643_s9 + $0x8] sm:$0x3f] }
 0xd35   :  { %1013 = vmax.xlane.f32.xlu0 %v1012_v52  ;;  %v1143_v48 = vrot.slane %v2546_v46, %v507_v4 }
 0xd36   :  { %v1015_v50 = vsel %vm296_vm6, %v1009_v39, -inf  ;;  %v942_v56 = vsel %vm296_vm6, %v936_v51, -inf }
 0xd39   :  { %1016 = vmax.xlane.f32.xlu0 %v1015_v50 }
 0xd3d   :  { %940 = vmax.xlane.f32.xlu0 %v939_v55 }
 0xd41   :  { %943 = vmax.xlane.f32.xlu0 %v942_v56 }
 0xdc2   :  { %v1014_v58 = vpop.xlane.xlu0 %1013 }
 0xdc3   :  { %v1018_v59 = vsub.f32 %v1006_v41, %v1014_v58 }
 0xdc5   :  { %v1020_v60 = vmul.f32 1.442695, %v1018_v59 }
 0xdc6   :  { %v1017_v61 = vpop.xlane.xlu0 %1016 }
 0xdc7   :  { %1946 = vpow2.f32 %v1020_v60  ;;  %v1019_v62 = vsub.f32 %v1009_v39, %v1017_v61 }
 0xdc9   :  { %v1022_v54 = vmul.f32 1.442695, %v1019_v62 }
 0xdca   :  { %v941_v0 = vpop.xlane.xlu0 %940 }
 0xdcb   :  { %v945_v2 = vsub.f32 %v933_v53, %v941_v0 }
 0xdcd   :  { %v947_v6 = vmul.f32 1.442695, %v945_v2 }
 0xdce   :  { %v944_v7 = vpop.xlane.xlu0 %943 }
 0xdcf   :  { %1948 = vpow2.f32 %v947_v6  ;;  %v946_v8 = vsub.f32 %v936_v51, %v944_v7  ;;  %v1905_v7 = vld [vmem:[%s2640_s6 + $0x18] sm:$0xff]  }
 0xdd0   :  { %1950 = vpow2.f32 %v1022_v54 }
 0xdd1   :  { %v1947_v57 = vpop.eup %1946  ;;  %v949_v9 = vmul.f32 1.442695, %v946_v8 }
 0xdd2   :  { %v1024_v10 = vsel %vm296_vm6, %v1947_v57, 0.0 }
 0xdd3   :  { %1025 = vadd.xlane.f32.xlu1 %v1024_v10  ;;  %1952 = vpow2.f32 %v949_v9 }
 0xdd9   :  { %v1949_v11 = vpop.eup %1948 }
 0xdda   :  { %v951_v13 = vsel %vm296_vm6, %v1949_v11, 0.0  ;;  %v1951_v14 = vpop.eup %1950 }
 0xddb   :  { %952 = vadd.xlane.f32.xlu0 %v951_v13  ;;  %v1027_v16 = vsel %vm296_vm6, %v1951_v14, 0.0 }
 0xddd   :  { %v1953_v17 = vpop.eup %1952 }
 0xdde   :  { %v954_v18 = vsel %vm296_vm6, %v1953_v17, 0.0 }
 0xddf   :  { %1028 = vadd.xlane.f32.xlu0 %v1027_v16  ;;  %v1231_v16 = vrot.slane %v2546_v46, %v595_v38  ;;  %v1906_v38 = vld [vmem:[%s2642_s8 + $0x20] sm:$0xff]  }
 0xde3   :  { %955 = vadd.xlane.f32.xlu0 %v954_v18 }
 0xde4   :  { %1087 = vrot.lane.b32.xlu1 %v964_v35, %s2125_s4 }
 0xdf9   :  { %1039 = vrot.lane.b32.xlu0 %v1037_v44, %s2125_s4 }
 0xe60   :  { %v1026_v20 = vpop.xlane.xlu1 %1025 }
 0xe61   :  { %1954 = vrcp.f32 %v1026_v20 }
 0xe64   :  { %v1088_v28 = vpop.permute.xlu1 %1087 }
 0xe68   :  { %v953_v5 = vpop.xlane.xlu0 %952 }
 0xe6b   :  { %v1955_v25 = vpop.eup %1954 }
 0xe6c   :  { %v1029_v21 = vpop.xlane.xlu0 %1028  ;;  %v1032_v32 = vmul.f32 %v1955_v25, %v1947_v57 }
 0xe6d   :  { %1956 = vrcp.f32 %v1029_v21 }
 0xe70   :  { %v956_v22 = vpop.xlane.xlu0 %955 }
 0xe71   :  { %1958 = vrcp.f32 %v956_v22 }
 0xe72   :  { %1960 = vrcp.f32 %v953_v5  ;;  %v1237_v5 = vrot.slane %v2546_v46, %v601_v45  ;;  %v1908_v45 = vld [vmem:[%s2642_s8 + $0x30] sm:$0xff]  }
 0xe74   :  { %v1040_v23 = vpop.permute.xlu0 %1039 }
 0xe75   :  { %1812 = vmatpush3.bf16.msra.mxu0 %v1040_v23 }
 0xe76   :  { %1817 = vmatprep.subr.bf16.mxu0 %v2127_v15 }
 0xe77   :  { %v1957_v31 = vpop.eup %1956 }
 0xe78   :  { %v1033_v26 = vmul.f32 %v1957_v31, %v1951_v14  ;;  %v1907_v31 = vld [vmem:[%s2642_s8 + $0x28] sm:$0xff]  }
 0xe7a   :  { %v1034_v27 = vpack.c.bf16 %v1033_v26, %v1032_v32  ;;  %v1909_v32 = vld [vmem:[%s2642_s8 + $0x38] sm:$0xff]   ;;  %v1656_v26 = vld [vmem:[#allocation8 + $0x1] ss:$0 sm:$0xff] }
 0xe7b   :  { %v1959_v30 = vpop.eup %1958 }
 0xe7c   :  { %1814 = vmatmul.mubr.msk.bf16.vlgmr.msra.gmra.mrb[24].mxu0 %vm296_vm6, %v1034_v27  ;;  %v1961_v33 = vpop.eup %1960  ;;  %v960_v35 = vmul.f32 %v1959_v30, %v1953_v17 }
 0xe7d   :  { %1818 = vmatpush3.bf16.msra.mxu0 %v1088_v28  ;;  %1819 = vmatprep.mubr.msk.bf16.mxu0 %vm2128_vm1, %v2127_v15  ;;  %v959_v44 = vmul.f32 %v1961_v33, %v1949_v11 }
 0xe7e   :  { %1839 = vmatprep.subr.bf16.mxu0 %v2127_v15 }
 0xe7f   :  { %v961_v47 = vpack.c.bf16 %v960_v35, %v959_v44 }
 0xe88   :  { %1820 = vmatmul.mubr.msk.bf16.vlgmr.msra.gmra.mrb[24].mxu0 %vm296_vm6, %v961_v47 }
 0xe89   :  { %1847 = vmatprep.mubr.msk.bf16.mxu0 %vm2128_vm1, %v2127_v15  ;;  %1840 = vmatpush3.bf16.msra.mxu0 %v1906_v38  ;;  %v1441_v38 = vrot.slane %v2546_v46, %v803_v63  ;;  %v1912_v63 = vld [vmem:[#allocation10] sm:$0xff]  }
 0xe8a   :  { %1841 = vmatprep.subr.bf16.mxu0 %v2127_v15 }
 0xe8d   :  { %1842 = vmatpush3.bf16.msra.mxu0 %v1907_v31 }
 0xe8e   :  { %1843 = vmatprep.subr.bf16.mxu0 %v2127_v15 }
 0xe91   :  { %1844 = vmatpush3.bf16.msra.mxu0 %v1908_v45  ;;  %v1447_v45 = vrot.slane %v2546_v46, %v809_v1  ;;  %v1673_v1 = vld [vmem:[%s2645_s11] ss:$0 sm:$0xff]  ;;  %s2086_s11 = scalar_lea.vmem %s1598_s26, 32 }
 0xe92   :  { %1845 = vmatprep.subr.bf16.mxu0 %v2127_v15  ;;  %p2087_p12 = scmp.ne.s32.totalorder %s1598_s26, %s2086_s11  ;;  %p2092_p0 = scmp.lt.s32.totalorder %s2086_s11, %s2086_s11 }
 0xe94   :  { %p2093_p1 = por %p2092_p0, %p2091_p13 }
 0xe95   :  { %1846 = vmatpush3.bf16.msra.mxu0 %v1909_v32 }
 0xe96   :  { %p2094_p2 = pnand %p2093_p1, %p2087_p12 }
 0xf5b   :  { %v1127_v36 = vpop.f32.mrb[24].mxu0 }
 0xf5c   :  { %v1821_v37 = vpop.f32.mrb[25].mxu0 }
 0xf5d   :  { %v1130_v41 = vpop.f32.mrb[26].mxu0 }
 0xf5e   :  { %v1134_v42 = vpack.c.bf16 %v1130_v41, %v1127_v36  ;;  %v1822_v43 = vpop.f32.mrb[27].mxu0 }
 0xf60   :  { %1828 = vmatmul.mubr.msk.bf16.vlgmr.msra.gmra.mrb[16].mxu1 %vm133_vm0, %v1134_v42 }
 0xf61   :  { %1835 = vmatprep.mubr.msk.bf16.mxu1 %vm2128_vm1, %v2127_v15 }
0x1033   :  { %v1193_v39 = vpop.f32.mrb[16].mxu1 }
0x1034   :  { %v1194_v49 = vadd.f32 %v1193_v39, %v1143_v48  ;;  %v1829_v40 = vpop.f32.mrb[17].mxu1 }
0x1035   :  { %v1196_v52 = vpop.f32.mrb[18].mxu1 }
0x1036   :  { %v1197_v53 = vadd.f32 %v1196_v52, %v1143_v48  ;;  %v1830_v50 = vpop.f32.mrb[19].mxu1  ;;  %v1200_v51 = vadd.f32 %v1194_v49, %v2471_v12 }
0x1038   :  { %v1202_v55 = vsel %vm133_vm0, %v1200_v51, 0.0  ;;  %v1201_v56 = vadd.f32 %v1197_v53, %v2473_v34  ;;  %v1904_v34 = vld [vmem:[%s2640_s6 + $0x10] sm:$0xff]  }
0x1039   :  { %1203 = vadd.xlane.f32.xlu0 %v1202_v55  ;;  %1832 = vmatpush3.bf16.msra.mxu1 %v1904_v34 }
0x103a   :  { %v1205_v58 = vsel %vm133_vm0, %v1201_v56, 0.0  ;;  %1833 = vmatprep.subr.bf16.mxu1 %v2127_v15 }
0x103b   :  { %1206 = vadd.xlane.f32.xlu1 %v1205_v58 }
0x103d   :  { %1834 = vmatpush3.bf16.msra.mxu1 %v1905_v7 }
0x103e   :  { %1851 = vmatprep.subr.bf16.mxu1 %v2127_v15 }
0x10c6   :  { %v1204_v59 = vpop.xlane.xlu0 %1203 }
0x10c7   :  { %v1208_v60 = vmul.f32 0.03125, %v1204_v59 }
0x10c8   :  { %v1207_v61 = vpop.xlane.xlu1 %1206 }
0x10c9   :  { %v1210_v4 = vsub.f32 %v1200_v51, %v1208_v60  ;;  %v1209_v62 = vmul.f32 0.03125, %v1207_v61  ;;  %v1341_v60 = vrot.slane %v2546_v46, %v702_v24 }
0x10cb   :  { %v1211_v0 = vsub.f32 %v1201_v56, %v1209_v62  ;;  %v1212_v2 = vmul.f32 %v1210_v4, %v1210_v4 }
0x10cd   :  { %v1214_v54 = vsel %vm133_vm0, %v1212_v2, 0.0  ;;  %v1213_v6 = vmul.f32 %v1211_v0, %v1211_v0 }
0x10ce   :  { %1215 = vadd.xlane.f32.xlu0 %v1214_v54 }
0x10cf   :  { %v1217_v12 = vsel %vm133_vm0, %v1213_v6, 0.0 }
0x10d2   :  { %1218 = vadd.xlane.f32.xlu0 %v1217_v12 }
0x115b   :  { %v1216_v8 = vpop.xlane.xlu0 %1215 }
0x115c   :  { %v1220_v57 = vmul.f32 0.03125, %v1216_v8 }
0x115e   :  { %v1222_v9 = vadd.f32 1e-12, %v1220_v57 }
0x115f   :  { %v1219_v10 = vpop.xlane.xlu0 %1218 }
0x1160   :  { %1962 = vrsqrt.f32 %v1222_v9  ;;  %v1221_v11 = vmul.f32 0.03125, %v1219_v10 }
0x1162   :  { %v1223_v13 = vadd.f32 1e-12, %v1221_v11 }
0x1164   :  { %1964 = vrsqrt.f32 %v1223_v13 }
0x116a   :  { %v1963_v14 = vpop.eup %1962 }
0x116b   :  { %v1226_v17 = vmul.f32 %v1963_v14, %v1210_v4 }
0x116d   :  { %v1232_v19 = vmul.f32 %v1231_v16, %v1226_v17 }
0x116e   :  { %v1965_v18 = vpop.eup %1964 }
0x116f   :  { %v1227_v20 = vmul.f32 %v1965_v18, %v1211_v0  ;;  %v1238_v22 = vadd.f32 %v1237_v5, %v1232_v19  ;;  %v1910_v18 = vld [vmem:[%s2644_s10] sm:$0xff]   ;;  %v1911_v19 = vld [vmem:[%s2644_s10 + $0x8] sm:$0xff]  }
0x1171   :  { %v1233_v21 = vmul.f32 %v1231_v16, %v1227_v20 }
0x1173   :  { %v1239_v23 = vadd.f32 %v1237_v5, %v1233_v21 }
0x1175   :  { %v1240_v25 = vpack.c.bf16 %v1239_v23, %v1238_v22 }
0x1177   :  { %1836 = vmatmul.mubr.msk.bf16.vlgmr.msra.gmra.mrb[20].mxu1 %vm133_vm0, %v1240_v25 }
0x1178   :  { %1855 = vmatprep.mubr.msk.bf16.mxu1 %vm2128_vm1, %v2127_v15  ;;  %1852 = vmatpush3.bf16.msra.mxu1 %v1910_v18 }
0x1179   :  { %1853 = vmatprep.subr.bf16.mxu1 %v2127_v15 }
0x117c   :  { %1854 = vmatpush3.bf16.msra.mxu1 %v1911_v19 }
0x117d   :  { %1859 = vmatprep.subr.bf16.mxu1 %v2127_v15 }
0x124a   :  { %v1303_v27 = vpop.f32.mrb[20].mxu1 }
0x124b   :  { %v1304_v28 = vadd.f32 %v1656_v26, %v1303_v27  ;;  %v1837_v30 = vpop.f32.mrb[21].mxu1 }
0x124c   :  { %v1306_v33 = vpop.f32.mrb[22].mxu1 }
0x124d   :  { %v1312_v35 = vmul.f32 0.044715, %v1304_v28  ;;  %v1307_v44 = vadd.f32 %v1656_v26, %v1306_v33  ;;  %v1838_v47 = vpop.f32.mrb[23].mxu1  ;;  %v1310_v50 = vmul.f32 0.5, %v1304_v28 }
0x124f   :  { %v1314_v29 = vmul.f32 %v1312_v35, %v1304_v28  ;;  %v1313_v36 = vmul.f32 0.044715, %v1307_v44  ;;  %v1311_v51 = vmul.f32 0.5, %v1307_v44 }
0x1251   :  { %v1316_v37 = vmul.f32 %v1314_v29, %v1304_v28  ;;  %v1315_v41 = vmul.f32 %v1313_v36, %v1307_v44 }
0x1253   :  { %v1318_v42 = vadd.f32 %v1316_v37, %v1304_v28  ;;  %v1317_v43 = vmul.f32 %v1315_v41, %v1307_v44 }
0x1255   :  { %v1320_v48 = vmul.f32 0.7978846, %v1318_v42  ;;  %v1319_v39 = vadd.f32 %v1317_v43, %v1307_v44 }
0x1257   :  { %1966 = vtanh.f32 %v1320_v48  ;;  %v1321_v49 = vmul.f32 0.7978846, %v1319_v39 }
0x1259   :  { %1968 = vtanh.f32 %v1321_v49 }
0x1261   :  { %v1967_v40 = vpop.eup %1966 }
0x1262   :  { %v1324_v52 = vadd.f32 1.0, %v1967_v40 }
0x1263   :  { %v1969_v53 = vpop.eup %1968 }
0x1264   :  { %v1325_v55 = vadd.f32 1.0, %v1969_v53  ;;  %v1326_v56 = vmul.f32 %v1324_v52, %v1310_v50 }
0x1266   :  { %v1327_v58 = vmul.f32 %v1325_v55, %v1311_v51 }
0x1268   :  { %v1328_v59 = vpack.c.bf16 %v1327_v58, %v1326_v56 }
0x126a   :  { %1848 = vmatmul.mubr.msk.bf16.vlgmr.msra.gmra.mrb[28].mxu0 %vm728_vm7, %v1328_v59 }
0x133d   :  { %v1403_v61 = vpop.f32.mrb[28].mxu0 }
0x133e   :  { %v1849_v4 = vpop.f32.mrb[29].mxu0  ;;  %v1404_v0 = vadd.f32 %v1403_v61, %v1341_v60 }
0x133f   :  { %v1406_v62 = vpop.f32.mrb[30].mxu0 }
0x1340   :  { %v1407_v2 = vadd.f32 %v1406_v62, %v1341_v60  ;;  %v1850_v54 = vpop.f32.mrb[31].mxu0  ;;  %v1410_v34 = vadd.f32 %v1404_v0, %v1238_v22 }
0x1342   :  { %v1411_v6 = vadd.f32 %v1407_v2, %v1239_v23  ;;  %v1412_v7 = vsel %vm133_vm0, %v1410_v34, 0.0 }
0x1344   :  { %v1415_v12 = vsel %vm133_vm0, %v1411_v6, 0.0 }
0x1345   :  { %1416 = vadd.xlane.f32.xlu0 %v1415_v12 }
0x1349   :  { %1413 = vadd.xlane.f32.xlu0 %v1412_v7 }
0x13d2   :  { %v1417_v8 = vpop.xlane.xlu0 %1416 }
0x13d3   :  { %v1419_v57 = vmul.f32 0.03125, %v1417_v8 }
0x13d5   :  { %v1421_v9 = vsub.f32 %v1411_v6, %v1419_v57 }
0x13d6   :  { %v1414_v10 = vpop.xlane.xlu0 %1413 }
0x13d7   :  { %v1418_v11 = vmul.f32 0.03125, %v1414_v10  ;;  %v1423_v24 = vmul.f32 %v1421_v9, %v1421_v9 }
0x13d9   :  { %v1420_v13 = vsub.f32 %v1410_v34, %v1418_v11  ;;  %v1427_v14 = vsel %vm133_vm0, %v1423_v24, 0.0 }
0x13da   :  { %1428 = vadd.xlane.f32.xlu0 %v1427_v14 }
0x13db   :  { %v1422_v16 = vmul.f32 %v1420_v13, %v1420_v13 }
0x13dd   :  { %v1424_v17 = vsel %vm133_vm0, %v1422_v16, 0.0 }
0x13de   :  { %1425 = vadd.xlane.f32.xlu0 %v1424_v17 }
0x1467   :  { %v1429_v20 = vpop.xlane.xlu0 %1428 }
0x1468   :  { %v1431_v5 = vmul.f32 0.03125, %v1429_v20 }
0x146a   :  { %v1433_v21 = vadd.f32 1e-12, %v1431_v5 }
0x146b   :  { %v1426_v22 = vpop.xlane.xlu0 %1425 }
0x146c   :  { %1970 = vrsqrt.f32 %v1433_v21  ;;  %v1430_v23 = vmul.f32 0.03125, %v1426_v22 }
0x146e   :  { %v1432_v25 = vadd.f32 1e-12, %v1430_v23 }
0x1470   :  { %1972 = vrsqrt.f32 %v1432_v25 }
0x1476   :  { %v1971_v31 = vpop.eup %1970 }
0x1477   :  { %v1437_v32 = vmul.f32 %v1971_v31, %v1421_v9 }
0x1479   :  { %v1443_v26 = vmul.f32 %v1441_v38, %v1437_v32 }
0x147a   :  { %v1973_v27 = vpop.eup %1972 }
0x147b   :  { %v1449_v28 = vadd.f32 %v1447_v45, %v1443_v26  ;;  %v1436_v30 = vmul.f32 %v1973_v27, %v1420_v13 }
0x147d   :  { %v1442_v33 = vmul.f32 %v1441_v38, %v1436_v30  ;;  %v1451_v44 = vrot.slane %v1449_v28, 7 }
0x147f   :  { %v1448_v35 = vadd.f32 %v1447_v45, %v1442_v33 }
0x1481   :  { %v1454_v47 = vsel %vm1453_vm8, %v1448_v35, %v1451_v44 }
0x1482   :  { %v1455_v29 = vpack.c.bf16 %v1454_v47, %v1454_v47 }
0x1484   :  { %1856 = vmatmul.mubr.msk.bf16.vlgmr.msra.gmra.mrb[24].mxu1 %vm133_vm0, %v1455_v29 }
0x1485   :  { %1863 = vmatprep.mubr.msk.bf16.mxu1 %vm2128_vm1, %v2127_v15  ;;  %1860 = vmatpush3.bf16.msra.mxu1 %v1912_v63 }
0x1486   :  { %1861 = vmatprep.subr.bf16.mxu1 %v2127_v15  ;;  %v1677_v15 = vld [vmem:[%s2647_s13] ss:$0 sm:$0xff] }
0x1489   :  { %1862 = vmatpush3.bf16.msra.mxu1 %v1913_v3 }
0x1557   :  { %v1516_v46 = vpop.f32.mrb[24].mxu1 }
0x1558   :  { %v1517_v36 = vadd.f32 %v1673_v1, %v1516_v46  ;;  %v1857_v37 = vpop.f32.mrb[25].mxu1 }
0x1559   :  { %v1519_v41 = vpop.f32.mrb[26].mxu1 }
0x155a   :  { %1974 = vtanh.f32 %v1517_v36  ;;  %v1858_v42 = vpop.f32.mrb[27].mxu1 }
0x1564   :  { %v1975_v43 = vpop.eup %1974 }
0x1565   :  { %v1523_v48 = vpack.c.bf16 %v1975_v43, %v1975_v43 }
0x1567   :  { %1864 = vmatmul.mubr.msk.bf16.vlgmr.msra.gmra.mrb[28].mxu1 %vm133_vm0, %v1523_v48 }
0x163a   :  { %v1584_v39 = vpop.f32.mrb[28].mxu1 }
0x163b   :  { %v1585_v49 = vadd.f32 %v1677_v15, %v1584_v39  ;;  %v1865_v40 = vpop.f32.mrb[29].mxu1 }
0x163c   :  { %v1587_v52 = vpop.f32.mrb[30].mxu1 }
0x163d   :  { %1590 = vst [vmem:[#allocation11] sm:$0x3] %v1585_v49  ;;  %v1866_v53 = vpop.f32.mrb[31].mxu1 }
0x163e   :  { %2097 = shalt.err (!%p2094_p2)
}
0x163f   :  { %s2098_s13 = scalar_lea.hbm %s2648_s14, 32 }
0x1640   :  { %p2099_p3 = scmp.ne.s32.totalorder %s2648_s14, %s2098_s13  ;;  %p2102_p4 = scmp.lt.u32.totalorder %s2098_s13, %s2648_s14 }
0x1642   :  { %p2104_p5 = pnand %p2102_p4, %p2099_p3 }
0x1644   :  { %2107 = shalt.err (!%p2104_p5)
}
0x1645   :  { %1600 = dma.vmem_to_hbm [thread:$0]  %s1598_s26, 32, %s2648_s14, [#allocation4]  }
0x1646   :  { %2114 = dma.done.wait [#allocation4], 32  }
0x1647   :  { %2115 = vsyncadd [#allocation4], 4294967264 }
0x1648   :  { %1604 = vsyncpa [#allocation3], 1 }
0x1649   :  { %1605 = vsyncpa [#allocation6], 1 }
0x164a   :  { %1606 = vsyncpa [#allocation9], 1 }
0x164b   :  { %1607 = vsyncpa [#allocation4], 1 }

</bundles_post_ra>
